<compile_context>
chip_gen: v5e
topology: v5e:2x2
jax: 0.10.0
libtpu: 0.0.40
codegen_flags: <defaults>
</compile_context>

<pallas_src>
import functools

import jax
import jax.numpy as jnp
from jax import lax
from jax.experimental import pallas as pl
from jax.experimental.pallas import tpu as pltpu

HIDDEN = 320
LANE = 128
SUBLANE = 8
DEFAULT_TILE_B = 1024


def _round_up(x, m):
    return (x + m - 1) // m * m


def critic_kernel(x_ref, w1_ref, b1_ref, w2_ref, b2_ref, w3_ref, b3_ref, o_ref):
    # x_ref : (TILE_B, D) f32   -- natural layout, batch tile on sublanes
    # w1_ref: (320, D)   f32    -- torch (out, in) layout
    # w2_ref: (320, 320) f32
    # b1/b2 : (320, 1)   f32    w3_ref: (320, 1) f32   b3_ref: (1, 1) f32
    # o_ref : (1, TILE_B) f32   -- lane-dense output row for this batch tile
    x = x_ref[...]
    # Contract over the last axis of BOTH operands -> transposed activation
    # (320, TILE_B); the MXU handles the operand "transpose" on-chip.
    h1 = lax.dot_general(w1_ref[...], x, (((1,), (1,)), ((), ())),
                         preferred_element_type=jnp.float32)        # (320, TILE_B)
    h1 = jnp.maximum(h1 + b1_ref[...], 0.0)
    h2 = jnp.dot(w2_ref[...], h1, preferred_element_type=jnp.float32)  # (320, TILE_B)
    h2 = jnp.maximum(h2 + b2_ref[...], 0.0)
    # 320 -> 1 head as VPU multiply + sublane (XLU) reduce; no wasteful N=1 matmul.
    v = jnp.sum(h2 * w3_ref[...], axis=0, keepdims=True)            # (1, TILE_B)
    o_ref[...] = (v + b3_ref[...]).astype(o_ref.dtype)


def prepare_params(w1, b1, w2, b2, w3, b3):
    """One-time layout plumbing (hoisted out of the per-call path).

    Inputs follow the x @ W + b convention:
      w1 (D, 320), b1 (1, 320), w2 (320, 320), b2 (1, 320), w3 (320, 1), b3 (1, 1).
    """
    w1t = jnp.asarray(w1, jnp.float32).T                  # (320, D)
    w2t = jnp.asarray(w2, jnp.float32).T                  # (320, 320)
    b1c = jnp.asarray(b1, jnp.float32).reshape(HIDDEN, 1)
    b2c = jnp.asarray(b2, jnp.float32).reshape(HIDDEN, 1)
    w3c = jnp.asarray(w3, jnp.float32).reshape(HIDDEN, 1)
    b3c = jnp.asarray(b3, jnp.float32).reshape(1, 1)
    return w1t, b1c, w2t, b2c, w3c, b3c


@functools.partial(jax.jit, static_argnames=("tile_b",))
def critic_forward_prepared(x, w1t, b1c, w2t, b2c, w3c, b3c, *, tile_b=DEFAULT_TILE_B):
    """x: (B, D) f32; params already laid out by prepare_params()."""
    B, D = x.shape

    if B <= tile_b:
        # Single tile: pad the batch only to a sublane multiple (block == full dims).
        tile_b = max(_round_up(B, SUBLANE), SUBLANE)
    else:
        # Multi-tile: tile must be a lane multiple (lane-dense output blocks).
        # num_tiles >= 2 here, so the "parallel" axis can shard across v7x's 2 TCs.
        tile_b = _round_up(tile_b, LANE)
    Bp = _round_up(B, tile_b)
    num_tiles = Bp // tile_b

    x = x.astype(jnp.float32)
    if Bp != B:
        x = jnp.pad(x, ((0, Bp - B), (0, 0)))   # batch pad only; no feature pad/transpose

    resident = lambda shape: pl.BlockSpec(shape, lambda i: (0, 0))   # VMEM-resident params

    # Size VMEM limit from the actual per-tile footprint (+headroom), not a fixed 32 MiB.
    bpf = 4  # f32 bytes
    x_tile_bytes = tile_b * D * bpf
    out_tile_bytes = tile_b * bpf
    param_bytes = (HIDDEN * D + HIDDEN * HIDDEN + 3 * HIDDEN + 1) * bpf
    interm_bytes = 2 * HIDDEN * tile_b * bpf
    footprint = 2 * (x_tile_bytes + out_tile_bytes + param_bytes) + interm_bytes
    vmem_limit = min(max(2 * footprint + (4 << 20), 16 << 20), 64 << 20)

    flops = 2 * Bp * (D * HIDDEN + HIDDEN * HIDDEN + HIDDEN)
    bytes_accessed = (Bp * D + Bp) * bpf + param_bytes

    out = pl.pallas_call(
        critic_kernel,
        out_shape=jax.ShapeDtypeStruct((1, Bp), jnp.float32),
        grid=(num_tiles,),
        in_specs=[
            pl.BlockSpec((tile_b, D), lambda i: (i, 0)),   # batch tile, natural layout
            resident((HIDDEN, D)),
            resident((HIDDEN, 1)),
            resident((HIDDEN, HIDDEN)),
            resident((HIDDEN, 1)),
            resident((HIDDEN, 1)),
            resident((1, 1)),
        ],
        out_specs=pl.BlockSpec((1, tile_b), lambda i: (0, i)),  # lane-dense output row
        compiler_params=pltpu.CompilerParams(
            dimension_semantics=("parallel",),
            vmem_limit_bytes=vmem_limit,
        ),
        cost_estimate=pl.CostEstimate(
            flops=flops, transcendentals=0, bytes_accessed=bytes_accessed),
    )(x, w1t, b1c, w2t, b2c, w3c, b3c)

    return out[0, :B].reshape(B, 1)


def critic_forward(x, w1, b1, w2, b2, w3, b3, *, tile_b=DEFAULT_TILE_B):
    """Convenience wrapper; prefer prepare_params() once + critic_forward_prepared()."""
    return critic_forward_prepared(x, *prepare_params(w1, b1, w2, b2, w3, b3),
                                   tile_b=tile_b)


def init_params(key, in_dim):
    # Deterministic PyTorch-style init: U(-1/sqrt(fan_in), 1/sqrt(fan_in)).
    ks = jax.random.split(key, 6)

    def lin(kw, kb, fan_in, fan_out):
        bound = 1.0 / jnp.sqrt(fan_in)
        w = jax.random.uniform(kw, (fan_in, fan_out), jnp.float32, -bound, bound)
        b = jax.random.uniform(kb, (1, fan_out), jnp.float32, -bound, bound)
        return w, b

    w1, b1 = lin(ks[0], ks[1], in_dim, HIDDEN)
    w2, b2 = lin(ks[2], ks[3], HIDDEN, HIDDEN)
    w3, b3 = lin(ks[4], ks[5], HIDDEN, 1)
    return w1, b1, w2, b2, w3, b3


def reference_f32(x, w1, b1, w2, b2, w3, b3):
    h1 = jax.nn.relu(x @ w1 + b1)
    h2 = jax.nn.relu(h1 @ w2 + b2)
    return h2 @ w3 + b3


if __name__ == "__main__":
    key = jax.random.PRNGKey(0)
    k_x, k_p, k_x2 = jax.random.split(key, 3)

    batch, in_dim = 8, 32
    x = jax.random.normal(k_x, (batch, in_dim), jnp.float32)
    params = init_params(k_p, in_dim)
    prepared = prepare_params(*params)

    value = critic_forward_prepared(x, *prepared)
    jax.block_until_ready(value)
    assert value.shape == (batch, 1)
    ref = reference_f32(x, *params)
    assert jnp.allclose(value, ref, atol=1e-3, rtol=1e-3)

    # Second case exercising the multi-tile batch grid + batch-padding path.
    batch2 = 300
    x2 = jax.random.normal(k_x2, (batch2, in_dim), jnp.float32)
    value2 = critic_forward_prepared(x2, *prepared, tile_b=128)  # grid=(3,), padded to 384
    jax.block_until_ready(value2)
    assert value2.shape == (batch2, 1)
    assert jnp.allclose(value2, reference_f32(x2, *params), atol=1e-3, rtol=1e-3)

    print("KERNEL_OK")
</pallas_src>

<mosaic_0001>
module attributes {stable_mosaic.version = 11 : i64} {
  func.func @critic_kernel(%arg0: i32, %arg1: memref<8x32xf32, #tpu.memory_space<vmem>>, %arg2: memref<320x32xf32, #tpu.memory_space<vmem>>, %arg3: memref<320x1xf32, #tpu.memory_space<vmem>>, %arg4: memref<320x320xf32, #tpu.memory_space<vmem>>, %arg5: memref<320x1xf32, #tpu.memory_space<vmem>>, %arg6: memref<320x1xf32, #tpu.memory_space<vmem>>, %arg7: memref<1x1xf32, #tpu.memory_space<vmem>>, %arg8: memref<1x8xf32, #tpu.memory_space<vmem>>) attributes {dimension_semantics = [#tpu.dimension_semantics<parallel>], iteration_bounds = array<i64: 1>, scalar_prefetch = 0 : i64, scratch_operands = 0 : i64, tpu.core_type = #tpu.core_type<tc>, window_params = [{transform_indices = @transform_0, window_bounds = array<i64: 8, 32>}, {pipeline_mode = #tpu.pipeline_mode<synchronous>, transform_indices = @transform_1, window_bounds = array<i64: 320, 32>}, {pipeline_mode = #tpu.pipeline_mode<synchronous>, transform_indices = @transform_2, window_bounds = array<i64: 320, 1>}, {pipeline_mode = #tpu.pipeline_mode<synchronous>, transform_indices = @transform_3, window_bounds = array<i64: 320, 320>}, {pipeline_mode = #tpu.pipeline_mode<synchronous>, transform_indices = @transform_4, window_bounds = array<i64: 320, 1>}, {pipeline_mode = #tpu.pipeline_mode<synchronous>, transform_indices = @transform_5, window_bounds = array<i64: 320, 1>}, {pipeline_mode = #tpu.pipeline_mode<synchronous>, transform_indices = @transform_6, window_bounds = array<i64: 1, 1>}, {transform_indices = @transform_7, window_bounds = array<i64: 1, 8>}]} {
    %c0 = arith.constant 0 : index
    %c0_0 = arith.constant 0 : index
    %0 = vector.load %arg1[%c0, %c0_0] : memref<8x32xf32, #tpu.memory_space<vmem>>, vector<8x32xf32>
    %c0_1 = arith.constant 0 : index
    %c0_2 = arith.constant 0 : index
    %1 = vector.load %arg2[%c0_1, %c0_2] : memref<320x32xf32, #tpu.memory_space<vmem>>, vector<320x32xf32>
    %cst = arith.constant dense<0.000000e+00> : vector<320x8xf32>
    %2 = tpu.matmul %1, %0, %cst {dimension_numbers = #tpu.dot_dimension_numbers<[1], [1], [0], [0], [0, 0, 1, 0], [], []>} : vector<320x32xf32>, vector<8x32xf32>, vector<320x8xf32> -> vector<320x8xf32>
    %c0_3 = arith.constant 0 : index
    %c0_4 = arith.constant 0 : index
    %3 = vector.load %arg3[%c0_3, %c0_4] : memref<320x1xf32, #tpu.memory_space<vmem>>, vector<320x1xf32>
    %4 = vector.broadcast %3 : vector<320x1xf32> to vector<320x8xf32>
    %5 = arith.addf %2, %4 : vector<320x8xf32>
    %cst_5 = arith.constant 0.000000e+00 : f32
    %6 = vector.broadcast %cst_5 : f32 to vector<320x8xf32>
    %7 = arith.maximumf %5, %6 : vector<320x8xf32>
    %c0_6 = arith.constant 0 : index
    %c0_7 = arith.constant 0 : index
    %8 = vector.load %arg4[%c0_6, %c0_7] : memref<320x320xf32, #tpu.memory_space<vmem>>, vector<320x320xf32>
    %cst_8 = arith.constant dense<0.000000e+00> : vector<320x8xf32>
    %9 = tpu.matmul %8, %7, %cst_8 {dimension_numbers = #tpu.dot_dimension_numbers<[1], [0], [0], [1], [0, 0, 1, 1], [], []>} : vector<320x320xf32>, vector<320x8xf32>, vector<320x8xf32> -> vector<320x8xf32>
    %c0_9 = arith.constant 0 : index
    %c0_10 = arith.constant 0 : index
    %10 = vector.load %arg5[%c0_9, %c0_10] : memref<320x1xf32, #tpu.memory_space<vmem>>, vector<320x1xf32>
    %11 = vector.broadcast %10 : vector<320x1xf32> to vector<320x8xf32>
    %12 = arith.addf %9, %11 : vector<320x8xf32>
    %cst_11 = arith.constant 0.000000e+00 : f32
    %13 = vector.broadcast %cst_11 : f32 to vector<320x8xf32>
    %14 = arith.maximumf %12, %13 : vector<320x8xf32>
    %c0_12 = arith.constant 0 : index
    %c0_13 = arith.constant 0 : index
    %15 = vector.load %arg6[%c0_12, %c0_13] : memref<320x1xf32, #tpu.memory_space<vmem>>, vector<320x1xf32>
    %16 = vector.broadcast %15 : vector<320x1xf32> to vector<320x8xf32>
    %17 = arith.mulf %14, %16 : vector<320x8xf32>
    %cst_14 = arith.constant dense<0.000000e+00> : vector<8xf32>
    %18 = vector.multi_reduction <add>, %17, %cst_14 [0] : vector<320x8xf32> to vector<8xf32>
    %19 = vector.shape_cast %18 : vector<8xf32> to vector<1x8xf32>
    %c0_15 = arith.constant 0 : index
    %c0_16 = arith.constant 0 : index
    %20 = vector.load %arg7[%c0_15, %c0_16] : memref<1x1xf32, #tpu.memory_space<vmem>>, vector<1x1xf32>
    %21 = vector.broadcast %20 : vector<1x1xf32> to vector<1x8xf32>
    %22 = arith.addf %19, %21 : vector<1x8xf32>
    %c0_17 = arith.constant 0 : index
    %c0_18 = arith.constant 0 : index
    %23 = vector.load %arg8[%c0_17, %c0_18] : memref<1x8xf32, #tpu.memory_space<vmem>>, vector<1x8xf32>
    tpu.vector_store %arg8[%c0_17, %c0_18], %22 {strides = array<i32>} : memref<1x8xf32, #tpu.memory_space<vmem>>, vector<1x8xf32>,
    return
  }
  func.func @transform_0(%arg0: i32) -> (i32, i32) {
    %c0_i32 = arith.constant 0 : i32
    %c0_i32_0 = arith.constant 0 : i32
    return %arg0, %c0_i32 : i32, i32
  }
  func.func @transform_1(%arg0: i32) -> (i32, i32) {
    %c0_i32 = arith.constant 0 : i32
    %c0_i32_0 = arith.constant 0 : i32
    %c0_i32_1 = arith.constant 0 : i32
    return %c0_i32, %c0_i32_0 : i32, i32
  }
  func.func @transform_2(%arg0: i32) -> (i32, i32) {
    %c0_i32 = arith.constant 0 : i32
    %c0_i32_0 = arith.constant 0 : i32
    %c0_i32_1 = arith.constant 0 : i32
    return %c0_i32, %c0_i32_0 : i32, i32
  }
  func.func @transform_3(%arg0: i32) -> (i32, i32) {
    %c0_i32 = arith.constant 0 : i32
    %c0_i32_0 = arith.constant 0 : i32
    %c0_i32_1 = arith.constant 0 : i32
    return %c0_i32, %c0_i32_0 : i32, i32
  }
  func.func @transform_4(%arg0: i32) -> (i32, i32) {
    %c0_i32 = arith.constant 0 : i32
    %c0_i32_0 = arith.constant 0 : i32
    %c0_i32_1 = arith.constant 0 : i32
    return %c0_i32, %c0_i32_0 : i32, i32
  }
  func.func @transform_5(%arg0: i32) -> (i32, i32) {
    %c0_i32 = arith.constant 0 : i32
    %c0_i32_0 = arith.constant 0 : i32
    %c0_i32_1 = arith.constant 0 : i32
    return %c0_i32, %c0_i32_0 : i32, i32
  }
  func.func @transform_6(%arg0: i32) -> (i32, i32) {
    %c0_i32 = arith.constant 0 : i32
    %c0_i32_0 = arith.constant 0 : i32
    %c0_i32_1 = arith.constant 0 : i32
    return %c0_i32, %c0_i32_0 : i32, i32
  }
  func.func @transform_7(%arg0: i32) -> (i32, i32) {
    %c0_i32 = arith.constant 0 : i32
    %c0_i32_0 = arith.constant 0 : i32
    return %c0_i32, %arg0 : i32, i32
  }
}

</mosaic_0001>

<bundles_post_ra>
// kernel: critic_forward_prepared.1
= control target key start
LH: loop header
LB: loop body
LE: loop exit
PB: predicated region body
PF: predicated region fallthrough
CT: control target
= control target key end

     0   :  { %s3426_s0 = inlined_call_operand.vmem [shape: f32[8,32], index: 0, kind: input, shape index: {}]   ;;  %s3427_s1 = inlined_call_operand.vmem [shape: f32[320,32], index: 1, kind: input, shape index: {}]   ;;  %s3428_s2 = inlined_call_operand.vmem [shape: f32[320,1], index: 2, kind: input, shape index: {}]   ;;  %s3429_s3 = inlined_call_operand.vmem [shape: f32[320,320], index: 3, kind: input, shape index: {}]   ;;  %s3430_s4 = inlined_call_operand.vmem [shape: f32[320,1], index: 4, kind: input, shape index: {}]   ;;  %s3431_s5 = inlined_call_operand.vmem [shape: f32[320,1], index: 5, kind: input, shape index: {}]   ;;  %s3432_s6 = inlined_call_operand.<no memory space> [shape: f32[1,1], index: 6, kind: input, shape index: {}]   ;;  %s3433_s7 = inlined_call_operand.hbm [shape: f32[1,8], index: 7, kind: output, shape index: {}]  }
   0x1   :  { %v12_v0 = vstv %s3432_s6 }
   0x2   :  { %13 = vst [vmem:[#allocation2] sm:$0x1] %v12_v0 }
   0x3   :  { %v29_v1 = vld [vmem:[%s3426_s0] sm:$0xff]  ;;  %vm310_vm0 = vcmask 261120   ;;  %v72_v3 = vld [vmem:[%s3428_s2 + $0x10] sm:$0xff]  ;;  %v2063_v4 = vmov 0  }
   0x4   :  { %v74_v2 = vld [vmem:[%s3428_s2 + $0x20] sm:$0xff]  ;;  %2036 = vset.pattern.permute.xlu2 %v2063_v4  ;;  %2035 = vset.pattern.permute.xlu1 %v2063_v4 }
   0x5   :  { %v70_v5 = vld [vmem:[%s3428_s2] sm:$0xff]  ;;  %2034 = vset.pattern.permute.xlu0 %v2063_v4  ;;  %1935 = vmatpush.xpose.msk.msra.mxu0 %vm310_vm0, %v29_v1 }
   0x6   :  { %v30_v6 = vld [vmem:[%s3427_s1] sm:$0xff]  ;;  %132 = vperm.xlu2 %2036, %v74_v2   ;;  %122 = vperm.xlu1 %2035, %v72_v3  }
   0x7   :  { %112 = vperm.xlu0 %2034, %v70_v5  }
   0x8   :  { %1936 = vmatmul.msk.f32.vlgmr.msra.gmra.mxu0 %vm310_vm0, %v30_v6 }
   0x9   :  { %14 = vsyncpa [#allocation4], 0  ;;  %v75_v7 = vld [vmem:[%s3428_s2 + $0x28] sm:$0xff]  ;;  %v73_v8 = vld [vmem:[%s3428_s2 + $0x18] sm:$0xff]  ;;  %vm971_vm1 = vcmask 523264   ;;  %vm1823_vm2 = vcmask 64512  }
   0xa   :  { %v71_v9 = vld [vmem:[%s3428_s2 + $0x8] sm:$0xff]  ;;  %v78_v11 = vld [vmem:[%s3428_s2 + $0x40] sm:$0xff]  ;;  %v77_v12 = vld [vmem:[%s3428_s2 + $0x38] sm:$0xff]  ;;  %vm1917_vm3 = vcmask 57344  }
   0xb   :  { %v31_v10 = vld [vmem:[%s3427_s1 + $0x8] sm:$0xff]  ;;  %v76_v13 = vld [vmem:[%s3428_s2 + $0x30] sm:$0xff]  ;;  %v81_v15 = vld [vmem:[%s3428_s2 + $0x58] sm:$0xff] }
   0xc   :  { %v32_v14 = vld [vmem:[%s3427_s1 + $0x10] sm:$0xff]  ;;  %v79_v17 = vld [vmem:[%s3428_s2 + $0x48] sm:$0xff]  ;;  %v33_v18 = vld [vmem:[%s3427_s1 + $0x18] sm:$0xff] }
   0xd   :  { %v80_v16 = vld [vmem:[%s3428_s2 + $0x50] sm:$0xff]  ;;  %v83_v20 = vld [vmem:[%s3428_s2 + $0x68] sm:$0xff]  ;;  %v82_v21 = vld [vmem:[%s3428_s2 + $0x60] sm:$0xff] }
   0xe   :  { %137 = vperm.xlu2 %2036, %v75_v7   ;;  %127 = vperm.xlu1 %2035, %v73_v8   ;;  %v84_v19 = vld [vmem:[%s3428_s2 + $0x70] sm:$0xff]  ;;  %v34_v22 = vld [vmem:[%s3427_s1 + $0x20] sm:$0xff]  ;;  %v87_v23 = vld [vmem:[%s3428_s2 + $0x88] sm:$0xff] }
   0xf   :  { %117 = vperm.xlu0 %2034, %v71_v9   ;;  %v86_v24 = vld [vmem:[%s3428_s2 + $0x80] sm:$0xff]  ;;  %v85_v25 = vld [vmem:[%s3428_s2 + $0x78] sm:$0xff]  ;;  %v35_v26 = vld [vmem:[%s3427_s1 + $0x28] sm:$0xff] }
  0x10   :  { %1937 = vmatmul.msk.f32.gmra.mxu0 %vm310_vm0, %v31_v10  ;;  %v90_v27 = vld [vmem:[%s3428_s2 + $0xa0] sm:$0xff]  ;;  %v89_v28 = vld [vmem:[%s3428_s2 + $0x98] sm:$0xff]  ;;  %v88_v29 = vld [vmem:[%s3428_s2 + $0x90] sm:$0xff] }
  0x11   :  { %v36_v30 = vld [vmem:[%s3427_s1 + $0x30] sm:$0xff]  ;;  %v93_v31 = vld [vmem:[%s3428_s2 + $0xb8] sm:$0xff]  ;;  %v91_v33 = vld [vmem:[%s3428_s2 + $0xa8] sm:$0xff] }
  0x12   :  { %v92_v32 = vld [vmem:[%s3428_s2 + $0xb0] sm:$0xff]  ;;  %v37_v34 = vld [vmem:[%s3427_s1 + $0x38] sm:$0xff]  ;;  %v95_v36 = vld [vmem:[%s3428_s2 + $0xc8] sm:$0xff] }
  0x13   :  { %v96_v35 = vld [vmem:[%s3428_s2 + $0xd0] sm:$0xff]  ;;  %v94_v37 = vld [vmem:[%s3428_s2 + $0xc0] sm:$0xff]  ;;  %v99_v39 = vld [vmem:[%s3428_s2 + $0xe8] sm:$0xff] }
  0x14   :  { %v38_v38 = vld [vmem:[%s3427_s1 + $0x40] sm:$0xff]  ;;  %v97_v41 = vld [vmem:[%s3428_s2 + $0xd8] sm:$0xff]  ;;  %v39_v42 = vld [vmem:[%s3427_s1 + $0x48] sm:$0xff] }
  0x15   :  { %v98_v40 = vld [vmem:[%s3428_s2 + $0xe0] sm:$0xff]  ;;  %v101_v44 = vld [vmem:[%s3428_s2 + $0xf8] sm:$0xff]  ;;  %v100_v45 = vld [vmem:[%s3428_s2 + $0xf0] sm:$0xff] }
  0x16   :  { %152 = vperm.xlu2 %2036, %v78_v11   ;;  %147 = vperm.xlu1 %2035, %v77_v12   ;;  %v102_v43 = vld [vmem:[%s3428_s2 + $0x100] sm:$0xff]  ;;  %v40_v46 = vld [vmem:[%s3427_s1 + $0x50] sm:$0xff]  ;;  %v109_v48 = vld [vmem:[%s3428_s2 + $0x138] sm:$0xff] }
  0x17   :  { %142 = vperm.xlu0 %2034, %v76_v13   ;;  %v108_v47 = vld [vmem:[%s3428_s2 + $0x130] sm:$0xff]  ;;  %v103_v49 = vld [vmem:[%s3428_s2 + $0x108] sm:$0xff]  ;;  %v41_v50 = vld [vmem:[%s3427_s1 + $0x58] sm:$0xff] }
  0x18   :  { %1938 = vmatmul.msk.f32.gmra.mxu0 %vm310_vm0, %v32_v14  ;;  %v105_v51 = vld [vmem:[%s3428_s2 + $0x118] sm:$0xff]  ;;  %v106_v52 = vld [vmem:[%s3428_s2 + $0x120] sm:$0xff]  ;;  %v107_v53 = vld [vmem:[%s3428_s2 + $0x128] sm:$0xff] }
  0x19   :  { %v42_v54 = vld [vmem:[%s3427_s1 + $0x60] sm:$0xff]  ;;  %v732_v55 = vld [vmem:[%s3430_s4 + $0x8] sm:$0xff]  ;;  %v104_v57 = vld [vmem:[%s3428_s2 + $0x110] sm:$0xff]  ;;  %s1926_s2 = sshll.u32 %s3433_s7, 4  ;;  %s1927_s2 = int_to_ptr.hbm [resolvable:$true] %s1926_s2 }
  0x1a   :  { %v731_v56 = vld [vmem:[%s3430_s4] sm:$0xff]  ;;  %v43_v58 = vld [vmem:[%s3427_s1 + $0x68] sm:$0xff]  ;;  %v734_v60 = vld [vmem:[%s3430_s4 + $0x18] sm:$0xff] }
  0x1b   :  { %v735_v59 = vld [vmem:[%s3430_s4 + $0x20] sm:$0xff]  ;;  %v733_v61 = vld [vmem:[%s3430_s4 + $0x10] sm:$0xff]  ;;  %v738_v63 = vld [vmem:[%s3430_s4 + $0x38] sm:$0xff] }
  0x1c   :  { %v44_v62 = vld [vmem:[%s3427_s1 + $0x70] sm:$0xff]  ;;  %v736_v1 = vld [vmem:[%s3430_s4 + $0x28] sm:$0xff]  ;;  %v45_v2 = vld [vmem:[%s3427_s1 + $0x78] sm:$0xff] }
  0x1d   :  { %v737_v0 = vld [vmem:[%s3430_s4 + $0x30] sm:$0xff]  ;;  %v740_v4 = vld [vmem:[%s3430_s4 + $0x48] sm:$0xff]  ;;  %v739_v5 = vld [vmem:[%s3430_s4 + $0x40] sm:$0xff] }
  0x1e   :  { %167 = vperm.xlu2 %2036, %v81_v15   ;;  %162 = vperm.xlu1 %2035, %v80_v16   ;;  %v741_v3 = vld [vmem:[%s3430_s4 + $0x50] sm:$0xff]  ;;  %v46_v7 = vld [vmem:[%s3427_s1 + $0x80] sm:$0xff]  ;;  %v744_v8 = vld [vmem:[%s3430_s4 + $0x68] sm:$0xff] }
  0x1f   :  { %157 = vperm.xlu0 %2034, %v79_v17   ;;  %v743_v9 = vld [vmem:[%s3430_s4 + $0x60] sm:$0xff]  ;;  %v742_v10 = vld [vmem:[%s3430_s4 + $0x58] sm:$0xff]  ;;  %v47_v12 = vld [vmem:[%s3427_s1 + $0x88] sm:$0xff] }
  0x20   :  { %1939 = vmatmul.msk.f32.gmra.mxu0 %vm310_vm0, %v33_v18  ;;  %v747_v13 = vld [vmem:[%s3430_s4 + $0x80] sm:$0xff]  ;;  %v746_v14 = vld [vmem:[%s3430_s4 + $0x78] sm:$0xff]  ;;  %v745_v15 = vld [vmem:[%s3430_s4 + $0x70] sm:$0xff] }
  0x21   :  { %v48_v17 = vld [vmem:[%s3427_s1 + $0x90] sm:$0xff]  ;;  %v750_v18 = vld [vmem:[%s3430_s4 + $0x98] sm:$0xff] }
  0x26   :  { %182 = vperm.xlu2 %2036, %v84_v19   ;;  %177 = vperm.xlu1 %2035, %v83_v20   ;;  %v749_v19 = vld [vmem:[%s3430_s4 + $0x90] sm:$0xff]  ;;  %v748_v20 = vld [vmem:[%s3430_s4 + $0x88] sm:$0xff] }
  0x27   :  { %172 = vperm.xlu0 %2034, %v82_v21  }
  0x28   :  { %1940 = vmatmul.msk.f32.gmra.mxu0 %vm310_vm0, %v34_v22  ;;  %v49_v22 = vld [vmem:[%s3427_s1 + $0x98] sm:$0xff] }
  0x2e   :  { %197 = vperm.xlu2 %2036, %v87_v23   ;;  %192 = vperm.xlu1 %2035, %v86_v24   ;;  %v753_v23 = vld [vmem:[%s3430_s4 + $0xb0] sm:$0xff]  ;;  %v752_v24 = vld [vmem:[%s3430_s4 + $0xa8] sm:$0xff] }
  0x2f   :  { %187 = vperm.xlu0 %2034, %v85_v25   ;;  %v751_v25 = vld [vmem:[%s3430_s4 + $0xa0] sm:$0xff] }
  0x30   :  { %1941 = vmatmul.msk.f32.gmra.mxu0 %vm310_vm0, %v35_v26 }
  0x36   :  { %212 = vperm.xlu2 %2036, %v90_v27   ;;  %207 = vperm.xlu1 %2035, %v89_v28   ;;  %v50_v27 = vld [vmem:[%s3427_s1 + $0xa0] sm:$0xff]  ;;  %v756_v28 = vld [vmem:[%s3430_s4 + $0xc8] sm:$0xff] }
  0x37   :  { %202 = vperm.xlu0 %2034, %v88_v29   ;;  %v755_v29 = vld [vmem:[%s3430_s4 + $0xc0] sm:$0xff] }
  0x38   :  { %1942 = vmatmul.msk.f32.gmra.mxu0 %vm310_vm0, %v36_v30  ;;  %v754_v30 = vld [vmem:[%s3430_s4 + $0xb8] sm:$0xff] }
  0x3e   :  { %227 = vperm.xlu2 %2036, %v93_v31   ;;  %222 = vperm.xlu1 %2035, %v92_v32   ;;  %v51_v32 = vld [vmem:[%s3427_s1 + $0xa8] sm:$0xff] }
  0x3f   :  { %217 = vperm.xlu0 %2034, %v91_v33   ;;  %v759_v33 = vld [vmem:[%s3430_s4 + $0xe0] sm:$0xff] }
  0x40   :  { %1943 = vmatmul.msk.f32.gmra.mxu0 %vm310_vm0, %v37_v34  ;;  %v758_v34 = vld [vmem:[%s3430_s4 + $0xd8] sm:$0xff] }
  0x46   :  { %242 = vperm.xlu2 %2036, %v96_v35   ;;  %237 = vperm.xlu1 %2035, %v95_v36   ;;  %v757_v35 = vld [vmem:[%s3430_s4 + $0xd0] sm:$0xff] }
  0x47   :  { %232 = vperm.xlu0 %2034, %v94_v37   ;;  %v52_v37 = vld [vmem:[%s3427_s1 + $0xb0] sm:$0xff] }
  0x48   :  { %1944 = vmatmul.msk.f32.gmra.mxu0 %vm310_vm0, %v38_v38  ;;  %v762_v38 = vld [vmem:[%s3430_s4 + $0xf8] sm:$0xff] }
  0x4e   :  { %257 = vperm.xlu2 %2036, %v99_v39   ;;  %252 = vperm.xlu1 %2035, %v98_v40   ;;  %v761_v39 = vld [vmem:[%s3430_s4 + $0xf0] sm:$0xff]  ;;  %v760_v40 = vld [vmem:[%s3430_s4 + $0xe8] sm:$0xff] }
  0x4f   :  { %247 = vperm.xlu0 %2034, %v97_v41  }
  0x50   :  { %1945 = vmatmul.msk.f32.gmra.mxu0 %vm310_vm0, %v39_v42  ;;  %v53_v42 = vld [vmem:[%s3427_s1 + $0xb8] sm:$0xff] }
  0x56   :  { %272 = vperm.xlu2 %2036, %v102_v43   ;;  %267 = vperm.xlu1 %2035, %v101_v44   ;;  %v765_v43 = vld [vmem:[%s3430_s4 + $0x110] sm:$0xff]  ;;  %v764_v44 = vld [vmem:[%s3430_s4 + $0x108] sm:$0xff] }
  0x57   :  { %262 = vperm.xlu0 %2034, %v100_v45   ;;  %v763_v45 = vld [vmem:[%s3430_s4 + $0x100] sm:$0xff] }
  0x58   :  { %1946 = vmatmul.msk.f32.gmra.mxu0 %vm310_vm0, %v40_v46 }
  0x5e   :  { %302 = vperm.xlu2 %2036, %v108_v47   ;;  %307 = vperm.xlu1 %2035, %v109_v48   ;;  %v54_v47 = vld [vmem:[%s3427_s1 + $0xc0] sm:$0xff] }
  0x5f   :  { %277 = vperm.xlu0 %2034, %v103_v49   ;;  %v768_v49 = vld [vmem:[%s3430_s4 + $0x128] sm:$0xff] }
  0x60   :  { %1947 = vmatmul.msk.f32.gmra.mxu0 %vm310_vm0, %v41_v50  ;;  %v767_v50 = vld [vmem:[%s3430_s4 + $0x120] sm:$0xff] }
  0x66   :  { %287 = vperm.xlu2 %2036, %v105_v51   ;;  %292 = vperm.xlu1 %2035, %v106_v52   ;;  %v766_v51 = vld [vmem:[%s3430_s4 + $0x118] sm:$0xff] }
  0x67   :  { %297 = vperm.xlu0 %2034, %v107_v53   ;;  %v55_v53 = vld [vmem:[%s3427_s1 + $0xc8] sm:$0xff] }
  0x68   :  { %1948 = vmatmul.msk.f32.gmra.mxu0 %vm310_vm0, %v42_v54  ;;  %v1543_v54 = vld [vmem:[%s3431_s5] sm:$0xff] }
  0x6e   :  { %778 = vperm.xlu2 %2036, %v732_v55   ;;  %773 = vperm.xlu1 %2035, %v731_v56   ;;  %v770_v55 = vld [vmem:[%s3430_s4 + $0x138] sm:$0xff]  ;;  %v2478_v56 = vpop.permute.xlu2 %132 }
  0x6f   :  { %282 = vperm.xlu0 %2034, %v104_v57   ;;  %v769_v57 = vld [vmem:[%s3430_s4 + $0x130] sm:$0xff] }
  0x70   :  { %1949 = vmatmul.msk.f32.gmra.mxu0 %vm310_vm0, %v43_v58 }
  0x76   :  { %793 = vperm.xlu2 %2036, %v735_v59   ;;  %788 = vperm.xlu1 %2035, %v734_v60   ;;  %v56_v60 = vld [vmem:[%s3427_s1 + $0xd0] sm:$0xff] }
  0x77   :  { %783 = vperm.xlu0 %2034, %v733_v61  }
  0x78   :  { %1950 = vmatmul.msk.f32.gmra.mxu0 %vm310_vm0, %v44_v62  ;;  %v2490_v61 = vpop.permute.xlu1 %122  ;;  %v1546_v62 = vld [vmem:[%s3431_s5 + $0x18] sm:$0xff] }
  0x79   :  { %v2455_v48 = vpop.permute.xlu0 %112 }
  0x7e   :  { %808 = vperm.xlu2 %2036, %v738_v63   ;;  %803 = vperm.xlu1 %2035, %v737_v0   ;;  %v1545_v63 = vld [vmem:[%s3431_s5 + $0x10] sm:$0xff]  ;;  %v1544_v0 = vld [vmem:[%s3431_s5 + $0x8] sm:$0xff] }
  0x7f   :  { %798 = vperm.xlu0 %2034, %v736_v1  }
  0x80   :  { %1951 = vmatmul.msk.f32.gmra.mxu0 %vm310_vm0, %v45_v2  ;;  %v57_v2 = vld [vmem:[%s3427_s1 + $0xd8] sm:$0xff] }
  0x81   :  { %v2483_v58 = vpop.permute.xlu0 %117 }
  0x85   :  { %v2329_v6 = vpop.f32.mrf.mxu0 }
  0x86   :  { %823 = vperm.xlu2 %2036, %v741_v3   ;;  %818 = vperm.xlu1 %2035, %v740_v4   ;;  %v2507_v3 = vpop.permute.xlu2 %137 }
  0x87   :  { %813 = vperm.xlu0 %2034, %v739_v5   ;;  %v2512_v5 = vpop.permute.xlu1 %127 }
  0x88   :  { %1952 = vmatmul.msk.f32.gmra.mxu0 %vm310_vm0, %v46_v7  ;;  %v1549_v7 = vld [vmem:[%s3431_s5 + $0x30] sm:$0xff] }
  0x89   :  { %v2509_v4 = vpop.permute.xlu0 %142 }
  0x8d   :  { %v2344_v11 = vpop.f32.mrf.mxu0 }
  0x8e   :  { %838 = vperm.xlu2 %2036, %v744_v8   ;;  %833 = vperm.xlu1 %2035, %v743_v9   ;;  %v1548_v8 = vld [vmem:[%s3431_s5 + $0x28] sm:$0xff]  ;;  %v1547_v9 = vld [vmem:[%s3431_s5 + $0x20] sm:$0xff] }
  0x8f   :  { %828 = vperm.xlu0 %2034, %v742_v10  }
  0x90   :  { %1953 = vmatmul.msk.f32.gmra.mxu0 %vm310_vm0, %v47_v12  ;;  %v58_v12 = vld [vmem:[%s3427_s1 + $0xe0] sm:$0xff] }
  0x95   :  { %v2359_v16 = vpop.f32.mrf.mxu0 }
  0x96   :  { %853 = vperm.xlu2 %2036, %v747_v13   ;;  %848 = vperm.xlu1 %2035, %v746_v14   ;;  %v2526_v13 = vpop.permute.xlu2 %152  ;;  %v158_v14 = vpop.permute.xlu0 %157 }
  0x97   :  { %843 = vperm.xlu0 %2034, %v745_v15   ;;  %v1552_v15 = vld [vmem:[%s3431_s5 + $0x48] sm:$0xff] }
  0x98   :  { %1954 = vmatmul.msk.f32.gmra.mxu0 %vm310_vm0, %v48_v17  ;;  %v1551_v17 = vld [vmem:[%s3431_s5 + $0x40] sm:$0xff] }
  0x9d   :  { %v2374_v21 = vpop.f32.mrf.mxu0 }
  0x9e   :  { %868 = vperm.xlu2 %2036, %v750_v18   ;;  %863 = vperm.xlu1 %2035, %v749_v19   ;;  %v2535_v18 = vpop.permute.xlu1 %147  ;;  %v1550_v19 = vld [vmem:[%s3431_s5 + $0x38] sm:$0xff] }
  0x9f   :  { %858 = vperm.xlu0 %2034, %v748_v20  }
  0xa0   :  { %1955 = vmatmul.msk.f32.gmra.mxu0 %vm310_vm0, %v49_v22  ;;  %v59_v22 = vld [vmem:[%s3427_s1 + $0xe8] sm:$0xff] }
  0xa5   :  { %v2389_v26 = vpop.f32.mrf.mxu0 }
  0xa6   :  { %883 = vperm.xlu2 %2036, %v753_v23   ;;  %878 = vperm.xlu1 %2035, %v752_v24   ;;  %v168_v23 = vpop.permute.xlu2 %167  ;;  %v173_v24 = vpop.permute.xlu0 %172 }
  0xa7   :  { %873 = vperm.xlu0 %2034, %v751_v25   ;;  %v1555_v25 = vld [vmem:[%s3431_s5 + $0x60] sm:$0xff] }
  0xa8   :  { %1956 = vmatmul.msk.f32.gmra.mxu0 %vm310_vm0, %v50_v27  ;;  %v1554_v27 = vld [vmem:[%s3431_s5 + $0x58] sm:$0xff] }
  0xad   :  { %v2404_v31 = vpop.f32.mrf.mxu0 }
  0xae   :  { %898 = vperm.xlu2 %2036, %v756_v28   ;;  %893 = vperm.xlu1 %2035, %v755_v29   ;;  %v1553_v28 = vld [vmem:[%s3431_s5 + $0x50] sm:$0xff] }
  0xaf   :  { %888 = vperm.xlu0 %2034, %v754_v30   ;;  %v60_v30 = vld [vmem:[%s3427_s1 + $0xf0] sm:$0xff] }
  0xb0   :  { %1957 = vmatmul.msk.f32.gmra.mxu0 %vm310_vm0, %v51_v32  ;;  %v163_v32 = vpop.permute.xlu1 %162 }
  0xb5   :  { %v2419_v36 = vpop.f32.mrf.mxu0 }
  0xb6   :  { %913 = vperm.xlu2 %2036, %v759_v33   ;;  %908 = vperm.xlu1 %2035, %v758_v34   ;;  %v1558_v33 = vld [vmem:[%s3431_s5 + $0x78] sm:$0xff]  ;;  %v1557_v34 = vld [vmem:[%s3431_s5 + $0x70] sm:$0xff] }
  0xb7   :  { %903 = vperm.xlu0 %2034, %v757_v35   ;;  %v183_v35 = vpop.permute.xlu2 %182 }
  0xb8   :  { %1958 = vmatmul.msk.f32.gmra.mxu0 %vm310_vm0, %v52_v37  ;;  %v1556_v37 = vld [vmem:[%s3431_s5 + $0x68] sm:$0xff] }
  0xbd   :  { %v2434_v41 = vpop.f32.mrf.mxu0 }
  0xbe   :  { %928 = vperm.xlu2 %2036, %v762_v38   ;;  %923 = vperm.xlu1 %2035, %v761_v39   ;;  %v188_v38 = vpop.permute.xlu0 %187 }
  0xbf   :  { %918 = vperm.xlu0 %2034, %v760_v40   ;;  %v61_v40 = vld [vmem:[%s3427_s1 + $0xf8] sm:$0xff] }
  0xc0   :  { %1959 = vmatmul.msk.f32.gmra.mxu0 %vm310_vm0, %v53_v42 }
  0xc5   :  { %v2449_v46 = vpop.f32.mrf.mxu0 }
  0xc6   :  { %943 = vperm.xlu2 %2036, %v765_v43   ;;  %938 = vperm.xlu1 %2035, %v764_v44   ;;  %v178_v44 = vpop.permute.xlu1 %177 }
  0xc7   :  { %933 = vperm.xlu0 %2034, %v763_v45  }
  0xc8   :  { %1960 = vmatmul.msk.f32.gmra.mxu0 %vm310_vm0, %v54_v47 }
  0xcd   :  { %v2466_v52 = vpop.f32.mrf.mxu0 }
  0xce   :  { %958 = vperm.xlu2 %2036, %v768_v49   ;;  %953 = vperm.xlu1 %2035, %v767_v50  }
  0xcf   :  { %948 = vperm.xlu0 %2034, %v766_v51   ;;  %v1561_v51 = vld [vmem:[%s3431_s5 + $0x90] sm:$0xff] }
  0xd0   :  { %1961 = vmatmul.msk.f32.gmra.mxu0 %vm310_vm0, %v55_v53  ;;  %v1560_v53 = vld [vmem:[%s3431_s5 + $0x88] sm:$0xff] }
  0xd5   :  { %v2485_v59 = vpop.f32.mrf.mxu0 }
  0xd6   :  { %1585 = vperm.xlu2 %2036, %v1543_v54   ;;  %968 = vperm.xlu1 %2035, %v770_v55   ;;  %v1559_v54 = vld [vmem:[%s3431_s5 + $0x80] sm:$0xff] }
  0xd7   :  { %963 = vperm.xlu0 %2034, %v769_v57  }
  0xd8   :  { %1962 = vmatmul.msk.f32.gmra.mxu0 %vm310_vm0, %v56_v60 }
  0xdd   :  { %v2502_v1 = vpop.f32.mrf.mxu0 }
  0xde   :  { %1600 = vperm.xlu2 %2036, %v1546_v62   ;;  %1595 = vperm.xlu1 %2035, %v1545_v63   ;;  %v485_v55 = vadd.f32 %v2502_v1, %v168_v23  ;;  %v62_v62 = vld [vmem:[%s3427_s1 + $0x100] sm:$0xff]  ;;  %v482_v63 = vadd.f32 %v2485_v59, %v163_v32  ;;  %v479_v1 = vadd.f32 %v2466_v52, %v158_v14  ;;  %v1572_v32 = vld [vmem:[%s3431_s5 + $0xe8] sm:$0xff] }
  0xdf   :  { %1590 = vperm.xlu0 %2034, %v1544_v0   ;;  %v476_v59 = vadd.f32 %v2449_v46, %v2526_v13  ;;  %v63_v46 = vld [vmem:[%s3427_s1 + $0x108] sm:$0xff]  ;;  %v470_v13 = vadd.f32 %v2419_v36, %v2509_v4  ;;  %v1567_v36 = vld [vmem:[%s3431_s5 + $0xc0] sm:$0xff]  ;;  %v1566_v4 = vld [vmem:[%s3431_s5 + $0xb8] sm:$0xff] }
  0xe0   :  { %1963 = vmatmul.msk.f32.gmra.mxu0 %vm310_vm0, %v57_v2  ;;  %v582_v2 = vmax.f32 %v485_v55, 0.0  ;;  %v580_v14 = vmax.f32 %v479_v1, 0.0  ;;  %v1581_v55 = vld [vmem:[%s3431_s5 + $0x130] sm:$0xff]  ;;  %v611_v1 = vld [vmem:[%s3429_s3] sm:$0xff] }
  0xe5   :  { %v487_v10 = vpop.f32.mrf.mxu0 }
  0xe6   :  { %1615 = vperm.xlu2 %2036, %v1549_v7   ;;  %1610 = vperm.xlu1 %2035, %v1548_v8   ;;  %v488_v50 = vadd.f32 %v487_v10, %v173_v24  ;;  %v581_v7 = vmax.f32 %v482_v63, 0.0  ;;  %v1564_v8 = vld [vmem:[%s3431_s5 + $0xa8] sm:$0xff]  ;;  %v1562_v10 = vld [vmem:[%s3431_s5 + $0x98] sm:$0xff] }
  0xe7   :  { %1605 = vperm.xlu0 %2034, %v1547_v9   ;;  %v1563_v9 = vld [vmem:[%s3431_s5 + $0xa0] sm:$0xff]  ;;  %v626_v63 = vld [vmem:[%s3429_s3 + $0x78] sm:$0xff] }
  0xe8   :  { %1964 = vmatmul.msk.f32.gmra.mxu0 %vm310_vm0, %v58_v12  ;;  %v583_v0 = vmax.f32 %v488_v50, 0.0  ;;  %v473_v12 = vadd.f32 %v2434_v41, %v2535_v18  ;;  %v467_v41 = vadd.f32 %v2404_v31, %v2507_v3  ;;  %v464_v18 = vadd.f32 %v2389_v26, %v2478_v56  ;;  %v1565_v31 = vld [vmem:[%s3431_s5 + $0xb0] sm:$0xff] }
  0xe9   :  { %v461_v26 = vadd.f32 %v2374_v21, %v2512_v5  ;;  %v64_v3 = vld [vmem:[%s3427_s1 + $0x110] sm:$0xff]  ;;  %v455_v5 = vadd.f32 %v2344_v11, %v2483_v58  ;;  %v1568_v11 = vld [vmem:[%s3431_s5 + $0xc8] sm:$0xff] }
  0xea   :  { %v576_v56 = vmax.f32 %v467_v41, 0.0  ;;  %v575_v23 = vmax.f32 %v464_v18, 0.0  ;;  %v68_v50 = vld [vmem:[%s3427_s1 + $0x130] sm:$0xff] }
  0xeb   :  { %v574_v21 = vmax.f32 %v461_v26, 0.0  ;;  %v572_v58 = vmax.f32 %v455_v5, 0.0  ;;  %v641_v26 = vld [vmem:[%s3429_s3 + $0xf0] sm:$0xff] }
  0xed   :  { %v490_v20 = vpop.f32.mrf.mxu0 }
  0xee   :  { %1630 = vperm.xlu2 %2036, %v1552_v15   ;;  %1625 = vperm.xlu1 %2035, %v1551_v17   ;;  %v491_v47 = vadd.f32 %v490_v20, %v178_v44  ;;  %v579_v15 = vmax.f32 %v476_v59, 0.0  ;;  %v578_v17 = vmax.f32 %v473_v12, 0.0  ;;  %v1579_v44 = vld [vmem:[%s3431_s5 + $0x120] sm:$0xff]  ;;  %v2739_v12 = vpop.permute.xlu0 %202 }
  0xef   :  { %1620 = vperm.xlu0 %2034, %v1550_v19   ;;  %v577_v19 = vmax.f32 %v470_v13, 0.0  ;;  %v635_v13 = vld [vmem:[%s3429_s3 + $0xc0] sm:$0xff] }
  0xf0   :  { %1965 = vmatmul.msk.f32.gmra.mxu0 %vm310_vm0, %v59_v22  ;;  %v584_v60 = vmax.f32 %v491_v47, 0.0  ;;  %v458_v22 = vadd.f32 %v2359_v16, %v2490_v61  ;;  %v452_v16 = vadd.f32 %v2329_v6, %v2455_v48  ;;  %v614_v48 = vld [vmem:[%s3429_s3 + $0x18] sm:$0xff] }
  0xf1   :  { %v1578_v47 = vld [vmem:[%s3431_s5 + $0x118] sm:$0xff] }
  0xf2   :  { %v573_v24 = vmax.f32 %v458_v22, 0.0  ;;  %v571_v6 = vmax.f32 %v452_v16, 0.0  ;;  %v644_v22 = vld [vmem:[%s3429_s3 + $0x108] sm:$0xff] }
  0xf5   :  { %v493_v29 = vpop.f32.mrf.mxu0 }
  0xf6   :  { %1645 = vperm.xlu2 %2036, %v1555_v25   ;;  %1640 = vperm.xlu1 %2035, %v1554_v27   ;;  %v494_v42 = vadd.f32 %v493_v29, %v183_v35  ;;  %v1570_v25 = vld [vmem:[%s3431_s5 + $0xd8] sm:$0xff]  ;;  %v1569_v27 = vld [vmem:[%s3431_s5 + $0xd0] sm:$0xff] }
  0xf7   :  { %1635 = vperm.xlu0 %2034, %v1553_v28   ;;  %v65_v28 = vld [vmem:[%s3427_s1 + $0x118] sm:$0xff]  ;;  %v1573_v29 = vld [vmem:[%s3431_s5 + $0xf0] sm:$0xff] }
  0xf8   :  { %1966 = vmatmul.msk.f32.gmra.mxu0 %vm310_vm0, %v60_v30  ;;  %v585_v49 = vmax.f32 %v494_v42, 0.0  ;;  %v617_v35 = vld [vmem:[%s3429_s3 + $0x30] sm:$0xff]  ;;  %v67_v42 = vld [vmem:[%s3427_s1 + $0x128] sm:$0xff] }
  0xfd   :  { %v496_v39 = vpop.f32.mrf.mxu0 }
  0xfe   :  { %v497_v43 = vadd.f32 %v496_v39, %v188_v38  ;;  %1660 = vperm.xlu2 %2036, %v1558_v33   ;;  %1655 = vperm.xlu1 %2035, %v1557_v34   ;;  %v1571_v33 = vld [vmem:[%s3431_s5 + $0xe0] sm:$0xff] }
  0xff   :  { %1650 = vperm.xlu0 %2034, %v1556_v37   ;;  %v66_v34 = vld [vmem:[%s3427_s1 + $0x120] sm:$0xff]  ;;  %v1576_v37 = vld [vmem:[%s3431_s5 + $0x108] sm:$0xff] }
 0x100   :  { %1967 = vmatmul.msk.f32.gmra.mxu0 %vm310_vm0, %v61_v40  ;;  %v586_v45 = vmax.f32 %v497_v43, 0.0  ;;  %v1575_v39 = vld [vmem:[%s3431_s5 + $0x100] sm:$0xff]  ;;  %v1574_v40 = vld [vmem:[%s3431_s5 + $0xf8] sm:$0xff]  ;;  %v620_v43 = vld [vmem:[%s3429_s3 + $0x48] sm:$0xff] }
 0x102   :  { %1092 = vmatpush.msrb.mxu0 %v586_v45  ;;  %2016 = vmatpush.msra.mxu1 %v586_v45 }
 0x104   :  { %1093 = vmatpush.msrb.mxu0 %v585_v49  ;;  %2017 = vmatpush.msra.mxu1 %v585_v49  ;;  %v1577_v49 = vld [vmem:[%s3431_s5 + $0x110] sm:$0xff] }
 0x105   :  { %v2580_v57 = vpop.f32.mrf.mxu0 }
 0x106   :  { %1675 = vperm.xlu2 %2036, %v1561_v51   ;;  %1670 = vperm.xlu1 %2035, %v1560_v53   ;;  %v623_v51 = vld [vmem:[%s3429_s3 + $0x60] sm:$0xff]  ;;  %v1582_v53 = vld [vmem:[%s3431_s5 + $0x138] sm:$0xff] }
 0x107   :  { %1665 = vperm.xlu0 %2034, %v1559_v54   ;;  %1094 = vmatpush.msrb.mxu0 %v584_v60 }
 0x108   :  { %2018 = vmatpush.msra.mxu1 %v584_v60  ;;  %1968 = vmatmul.msk.f32.gmra.mxu0 %vm310_vm0, %v62_v62  ;;  %v1580_v60 = vld [vmem:[%s3431_s5 + $0x128] sm:$0xff]  ;;  %v69_v62 = vld [vmem:[%s3427_s1 + $0x138] sm:$0xff] }
 0x109   :  { %1095 = vmatpush.msrb.mxu0 %v583_v0 }
 0x10a   :  { %2019 = vmatpush.msra.mxu1 %v583_v0 }
 0x10b   :  { %1096 = vmatpush.msrb.mxu0 %v582_v2 }
 0x10c   :  { %2020 = vmatpush.msra.mxu1 %v582_v2  ;;  %v1909_v2 = vld [vmem:[#allocation2] sm:$0x1] }
 0x10d   :  { %1097 = vmatpush.msrb.mxu0 %v581_v7  ;;  %v2599_v52 = vpop.f32.mrf.mxu0 }
 0x10e   :  { %2021 = vmatpush.msra.mxu1 %v581_v7  ;;  %1690 = vperm.xlu2 %2036, %v1564_v8   ;;  %v629_v7 = vld [vmem:[%s3429_s3 + $0x90] sm:$0xff]  ;;  %v2732_v8 = vpop.permute.xlu1 %192 }
 0x10f   :  { %1685 = vperm.xlu1 %2035, %v1563_v9   ;;  %1680 = vperm.xlu0 %2034, %v1562_v10   ;;  %v632_v9 = vld [vmem:[%s3429_s3 + $0xa8] sm:$0xff] }
 0x110   :  { %1098 = vmatpush.msrb.mxu0 %v580_v14  ;;  %2022 = vmatpush.msra.mxu1 %v580_v14 }
 0x111   :  { %1969 = vmatmul.msk.f32.gmra.mxu0 %vm310_vm0, %v63_v46  ;;  %v2741_v46 = vpop.permute.xlu2 %197 }
 0x112   :  { %1099 = vmatpush.msrb.mxu0 %v579_v15  ;;  %2023 = vmatpush.msra.mxu1 %v579_v15 }
 0x114   :  { %1100 = vmatpush.msrb.mxu0 %v578_v17  ;;  %2024 = vmatpush.msra.mxu1 %v578_v17  ;;  %v218_v17 = vpop.permute.xlu0 %217 }
 0x115   :  { %v2619_v20 = vpop.f32.mrf.mxu0 }
 0x116   :  { %1101 = vmatpush.msrb.mxu0 %v577_v19  ;;  %2025 = vmatpush.msra.mxu1 %v577_v19  ;;  %v2737_v10 = vpop.permute.xlu1 %207  ;;  %v638_v19 = vld [vmem:[%s3429_s3 + $0xd8] sm:$0xff] }
 0x117   :  { %1705 = vperm.xlu2 %2036, %v1567_v36   ;;  %1700 = vperm.xlu1 %2035, %v1566_v4  }
 0x118   :  { %1695 = vperm.xlu0 %2034, %v1565_v31   ;;  %1102 = vmatpush.msrb.mxu0 %v576_v56 }
 0x119   :  { %2026 = vmatpush.msra.mxu1 %v576_v56  ;;  %1970 = vmatmul.msk.f32.gmra.mxu0 %vm310_vm0, %v64_v3  ;;  %v213_v18 = vpop.permute.xlu2 %212 }
 0x11a   :  { %1103 = vmatpush.msrb.mxu0 %v575_v23 }
 0x11b   :  { %2027 = vmatpush.msra.mxu1 %v575_v23 }
 0x11c   :  { %1104 = vmatpush.msrb.mxu0 %v574_v21  ;;  %v233_v31 = vpop.permute.xlu0 %232 }
 0x11d   :  { %2028 = vmatpush.msra.mxu1 %v574_v21  ;;  %v2639_v61 = vpop.f32.mrf.mxu0 }
 0x11e   :  { %1105 = vmatpush.msrb.mxu0 %v573_v24  ;;  %v223_v41 = vpop.permute.xlu1 %222 }
 0x11f   :  { %2029 = vmatpush.msra.mxu1 %v573_v24  ;;  %1720 = vperm.xlu2 %2036, %v1570_v25   ;;  %v647_v25 = vld [vmem:[%s3429_s3 + $0x120] sm:$0xff] }
 0x120   :  { %1715 = vperm.xlu1 %2035, %v1569_v27   ;;  %1710 = vperm.xlu0 %2034, %v1568_v11  }
 0x121   :  { %1106 = vmatpush.msrb.mxu0 %v572_v58  ;;  %2030 = vmatpush.msra.mxu1 %v572_v58  ;;  %v228_v56 = vpop.permute.xlu2 %227 }
 0x122   :  { %1971 = vmatmul.msk.f32.gmra.mxu0 %vm310_vm0, %v65_v28 }
 0x123   :  { %1107 = vmatpush.msrb.mxu0 %v571_v6  ;;  %2031 = vmatpush.msra.mxu1 %v571_v6 }
 0x124   :  { %1111 = vmatmul.f32.vlgmr.msra.gmra.mxu1 %v614_v48  ;;  %v248_v21 = vpop.permute.xlu0 %247 }
 0x125   :  { %v2657_v30 = vpop.f32.mrf.mxu0 }
 0x126   :  { %v238_v4 = vpop.permute.xlu1 %237 }
 0x127   :  { %1735 = vperm.xlu2 %2036, %v1573_v29  }
 0x128   :  { %1730 = vperm.xlu1 %2035, %v1572_v32   ;;  %1725 = vperm.xlu0 %2034, %v1571_v33   ;;  %v650_v32 = vld [vmem:[%s3429_s3 + $0x138] sm:$0xff] }
 0x129   :  { %v243_v5 = vpop.permute.xlu2 %242 }
 0x12a   :  { %1972 = vmatmul.msk.f32.gmra.mxu0 %vm310_vm0, %v66_v34 }
 0x12c   :  { %1114 = vmatmul.f32.gmra.mxu1 %v617_v35  ;;  %v263_v27 = vpop.permute.xlu0 %262 }
 0x12d   :  { %v2675_v38 = vpop.f32.mrf.mxu0 }
 0x12e   :  { %v253_v23 = vpop.permute.xlu1 %252 }
 0x12f   :  { %1750 = vperm.xlu2 %2036, %v1576_v37  }
 0x130   :  { %1745 = vperm.xlu1 %2035, %v1575_v39   ;;  %1740 = vperm.xlu0 %2034, %v1574_v40  }
 0x131   :  { %v258_v6 = vpop.permute.xlu2 %257 }
 0x132   :  { %1973 = vmatmul.msk.f32.gmra.mxu0 %vm310_vm0, %v67_v42 }
 0x134   :  { %1117 = vmatmul.f32.gmra.mxu1 %v620_v43 }
 0x135   :  { %v2693_v45 = vpop.f32.mrf.mxu0 }
 0x136   :  { %v268_v16 = vpop.permute.xlu1 %267 }
 0x137   :  { %1765 = vperm.xlu2 %2036, %v1579_v44  }
 0x138   :  { %1760 = vperm.xlu1 %2035, %v1578_v47   ;;  %1755 = vperm.xlu0 %2034, %v1577_v49   ;;  %v653_v47 = vld [vmem:[%s3429_s3 + $0x150] sm:$0xff] }
 0x13a   :  { %1974 = vmatmul.msk.f32.gmra.mxu0 %vm310_vm0, %v68_v50 }
 0x13c   :  { %1120 = vmatmul.f32.gmra.mxu1 %v623_v51 }
 0x13d   :  { %v2711_v54 = vpop.f32.mrf.mxu0 }
 0x13e   :  { %v521_v51 = vadd.f32 %v2711_v54, %v228_v56  ;;  %v308_v56 = vpop.permute.xlu1 %307 }
 0x13f   :  { %1780 = vperm.xlu2 %2036, %v1582_v53  }
 0x140   :  { %1775 = vperm.xlu1 %2035, %v1581_v55   ;;  %1770 = vperm.xlu0 %2034, %v1580_v60   ;;  %v518_v55 = vadd.f32 %v2693_v45, %v223_v41  ;;  %v665_v41 = vld [vmem:[%s3429_s3 + $0x1b0] sm:$0xff] }
 0x142   :  { %1975 = vmatmul.msk.f32.gmra.mxu0 %vm310_vm0, %v69_v62  ;;  %v593_v54 = vmax.f32 %v518_v55, 0.0  ;;  %v613_v55 = vld [vmem:[%s3429_s3 + $0x10] sm:$0xff] }
 0x144   :  { %1123 = vmatmul.f32.gmra.mxu1 %v626_v63  ;;  %v515_v63 = vadd.f32 %v2675_v38, %v218_v17  ;;  %v618_v17 = vld [vmem:[%s3429_s3 + $0x38] sm:$0xff] }
 0x145   :  { %v523_v0 = vpop.f32.mrf.mxu0 }
 0x146   :  { %v524_v49 = vadd.f32 %v523_v0, %v233_v31  ;;  %v656_v0 = vld [vmem:[%s3429_s3 + $0x168] sm:$0xff]  ;;  %v592_v45 = vmax.f32 %v515_v63, 0.0  ;;  %v621_v31 = vld [vmem:[%s3429_s3 + $0x50] sm:$0xff] }
 0x147   :  { %v616_v63 = vld [vmem:[%s3429_s3 + $0x28] sm:$0xff] }
 0x148   :  { %1912 = vperm.xlu0 %2034, %v1909_v2   ;;  %v595_v60 = vmax.f32 %v524_v49, 0.0  ;;  %v594_v2 = vmax.f32 %v521_v51, 0.0  ;;  %v630_v51 = vld [vmem:[%s3429_s3 + $0x98] sm:$0xff] }
 0x14a   :  { %1108 = vmatmul.f32.vlgmr.msrb.gmra.mxu0 %v611_v1  ;;  %v512_v1 = vadd.f32 %v2657_v30, %v213_v18  ;;  %v659_v30 = vld [vmem:[%s3429_s3 + $0x180] sm:$0xff] }
 0x14c   :  { %1126 = vmatmul.f32.gmra.mxu1 %v629_v7  ;;  %v509_v7 = vadd.f32 %v2639_v61, %v2737_v10  ;;  %v591_v38 = vmax.f32 %v512_v1, 0.0  ;;  %v500_v61 = vadd.f32 %v2580_v57, %v2732_v8  ;;  %v615_v57 = vld [vmem:[%s3429_s3 + $0x20] sm:$0xff] }
 0x14d   :  { %v526_v59 = vpop.f32.mrf.mxu0 }
 0x14e   :  { %v527_v43 = vadd.f32 %v526_v59, %v238_v4  ;;  %v506_v59 = vadd.f32 %v2619_v20, %v2739_v12  ;;  %v587_v20 = vmax.f32 %v500_v61, 0.0  ;;  %v278_v4 = vpop.permute.xlu0 %277  ;;  %v622_v61 = vld [vmem:[%s3429_s3 + $0x58] sm:$0xff] }
 0x150   :  { %v596_v53 = vmax.f32 %v527_v43, 0.0  ;;  %v589_v10 = vmax.f32 %v506_v59, 0.0  ;;  %v619_v59 = vld [vmem:[%s3429_s3 + $0x40] sm:$0xff] }
 0x154   :  { %1129 = vmatmul.f32.gmra.mxu1 %v632_v9 }
 0x155   :  { %v529_v14 = vpop.f32.mrf.mxu0 }
 0x156   :  { %v530_v40 = vadd.f32 %v529_v14, %v243_v5  ;;  %v503_v14 = vadd.f32 %v2599_v52, %v2741_v46  ;;  %v612_v52 = vld [vmem:[%s3429_s3 + $0x8] sm:$0xff]  ;;  %v662_v46 = vld [vmem:[%s3429_s3 + $0x198] sm:$0xff] }
 0x158   :  { %v597_v50 = vmax.f32 %v530_v40, 0.0 }
 0x15c   :  { %1132 = vmatmul.f32.gmra.mxu1 %v635_v13  ;;  %v590_v13 = vmax.f32 %v509_v7, 0.0  ;;  %v636_v7 = vld [vmem:[%s3429_s3 + $0xc8] sm:$0xff] }
 0x15d   :  { %v532_v15 = vpop.f32.mrf.mxu0 }
 0x15e   :  { %v533_v35 = vadd.f32 %v532_v15, %v248_v21  ;;  %v588_v15 = vmax.f32 %v503_v14, 0.0  ;;  %v624_v21 = vld [vmem:[%s3429_s3 + $0x68] sm:$0xff]  ;;  %v639_v14 = vld [vmem:[%s3429_s3 + $0xe0] sm:$0xff] }
 0x160   :  { %v598_v44 = vmax.f32 %v533_v35, 0.0 }
 0x164   :  { %1135 = vmatmul.f32.gmra.mxu1 %v638_v19  ;;  %v273_v19 = vpop.permute.xlu2 %272 }
 0x165   :  { %v535_v36 = vpop.f32.mrf.mxu0 }
 0x166   :  { %v536_v33 = vadd.f32 %v535_v36, %v253_v23  ;;  %v668_v36 = vld [vmem:[%s3429_s3 + $0x1c8] sm:$0xff]  ;;  %v298_v23 = vpop.permute.xlu0 %297 }
 0x168   :  { %v599_v42 = vmax.f32 %v536_v33, 0.0  ;;  %v627_v33 = vld [vmem:[%s3429_s3 + $0x80] sm:$0xff] }
 0x16c   :  { %1138 = vmatmul.f32.gmra.mxu1 %v641_v26 }
 0x16d   :  { %v538_v3 = vpop.f32.mrf.mxu0 }
 0x16e   :  { %v539_v48 = vadd.f32 %v538_v3, %v258_v6  ;;  %v671_v3 = vld [vmem:[%s3429_s3 + $0x1e0] sm:$0xff] }
 0x170   :  { %v600_v37 = vmax.f32 %v539_v48, 0.0 }
 0x174   :  { %1141 = vmatmul.f32.gmra.mxu1 %v644_v22  ;;  %v303_v22 = vpop.permute.xlu2 %302 }
 0x175   :  { %v541_v24 = vpop.f32.mrf.mxu0 }
 0x176   :  { %v542_v58 = vadd.f32 %v541_v24, %v263_v27 }
 0x178   :  { %v601_v34 = vmax.f32 %v542_v58, 0.0  ;;  %v293_v58 = vpop.permute.xlu1 %292 }
 0x17c   :  { %1144 = vmatmul.f32.gmra.mxu1 %v647_v25  ;;  %v288_v48 = vpop.permute.xlu2 %287 }
 0x17d   :  { %v544_v11 = vpop.f32.mrf.mxu0 }
 0x17e   :  { %v545_v28 = vadd.f32 %v544_v11, %v268_v16  ;;  %v674_v16 = vld [vmem:[%s3429_s3 + $0x1f8] sm:$0xff] }
 0x180   :  { %v602_v29 = vmax.f32 %v545_v28, 0.0 }
 0x182   :  { %1229 = vmatpush.msra.mxu2 %v602_v29 }
 0x184   :  { %1147 = vmatmul.f32.gmra.mxu1 %v650_v32  ;;  %1230 = vmatpush.msra.mxu2 %v601_v34  ;;  %v283_v34 = vpop.permute.xlu0 %282  ;;  %v2850_v1 = vpop.permute.xlu2 %778 }
 0x185   :  { %v2761_v39 = vpop.f32.mrf.mxu0 }
 0x186   :  { %1231 = vmatpush.msra.mxu2 %v600_v37 }
 0x188   :  { %1232 = vmatpush.msra.mxu2 %v599_v42  ;;  %v677_v42 = vld [vmem:[%s3429_s3 + $0x210] sm:$0xff] }
 0x18a   :  { %1233 = vmatpush.msra.mxu2 %v598_v44 }
 0x18c   :  { %1150 = vmatmul.f32.gmra.mxu1 %v653_v47  ;;  %1234 = vmatpush.msra.mxu2 %v597_v50  ;;  %v548_v47 = vadd.f32 %v2761_v39, %v273_v19  ;;  %v680_v39 = vld [vmem:[%s3429_s3 + $0x228] sm:$0xff]  ;;  %v695_v19 = vld [vmem:[%s3429_s3 + $0x2a0] sm:$0xff] }
 0x18e   :  { %v2768_v62 = vpop.f32.mrf.mxu0  ;;  %1235 = vmatpush.msra.mxu2 %v596_v53  ;;  %v603_v53 = vmax.f32 %v548_v47, 0.0  ;;  %v660_v47 = vld [vmem:[%s3429_s3 + $0x188] sm:$0xff] }
 0x18f   :  { %v551_v43 = vadd.f32 %v2768_v62, %v278_v4  ;;  %v633_v62 = vld [vmem:[%s3429_s3 + $0xb0] sm:$0xff] }
 0x190   :  { %1236 = vmatpush.msra.mxu2 %v595_v60 }
 0x191   :  { %v604_v50 = vmax.f32 %v551_v43, 0.0 }
 0x192   :  { %1237 = vmatpush.msra.mxu2 %v594_v2  ;;  %v683_v2 = vld [vmem:[%s3429_s3 + $0x240] sm:$0xff] }
 0x194   :  { %1153 = vmatmul.f32.gmra.mxu1 %v656_v0  ;;  %1238 = vmatpush.msra.mxu2 %v593_v54  ;;  %v2852_v54 = vpop.permute.xlu1 %773 }
 0x196   :  { %v553_v9 = vpop.f32.mrf.mxu0  ;;  %1239 = vmatpush.msra.mxu2 %v592_v45  ;;  %v2857_v45 = vpop.permute.xlu0 %783 }
 0x197   :  { %v554_v35 = vadd.f32 %v553_v9, %v283_v34 }
 0x198   :  { %1240 = vmatpush.msra.mxu2 %v591_v38  ;;  %v686_v38 = vld [vmem:[%s3429_s3 + $0x258] sm:$0xff] }
 0x199   :  { %v605_v49 = vmax.f32 %v554_v35, 0.0  ;;  %v640_v35 = vld [vmem:[%s3429_s3 + $0xe8] sm:$0xff] }
 0x19a   :  { %1241 = vmatpush.msra.mxu2 %v590_v13  ;;  %v2871_v13 = vpop.permute.xlu2 %793 }
 0x19c   :  { %1156 = vmatmul.f32.gmra.mxu1 %v659_v30  ;;  %1242 = vmatpush.msra.mxu2 %v589_v10  ;;  %v2873_v30 = vpop.permute.xlu1 %788  ;;  %v689_v10 = vld [vmem:[%s3429_s3 + $0x270] sm:$0xff] }
 0x19e   :  { %1243 = vmatpush.msra.mxu2 %v588_v15  ;;  %v2881_v15 = vpop.permute.xlu0 %798 }
 0x19f   :  { %v556_v12 = vpop.f32.mrf.mxu0 }
 0x1a0   :  { %1244 = vmatpush.msra.mxu2 %v587_v20  ;;  %v557_v29 = vadd.f32 %v556_v12, %v288_v48  ;;  %v642_v20 = vld [vmem:[%s3429_s3 + $0xf8] sm:$0xff]  ;;  %v625_v12 = vld [vmem:[%s3429_s3 + $0x70] sm:$0xff] }
 0x1a1   :  { %1245 = vmatmul.f32.vlgmr.msra.gmra.mxu2 %v612_v52  ;;  %v2819_v37 = vpop.f32.mrf.mxu1  ;;  %v637_v48 = vld [vmem:[%s3429_s3 + $0xd0] sm:$0xff] }
 0x1a2   :  { %v606_v44 = vmax.f32 %v557_v29, 0.0  ;;  %v704_v29 = vld [vmem:[%s3429_s3 + $0x2e8] sm:$0xff] }
 0x1a4   :  { %1159 = vmatmul.f32.gmra.mxu1 %v662_v46  ;;  %v2892_v46 = vpop.permute.xlu2 %808 }
 0x1a7   :  { %v559_v8 = vpop.f32.mrf.mxu0 }
 0x1a8   :  { %v560_v28 = vadd.f32 %v559_v8, %v293_v58  ;;  %v2897_v8 = vpop.permute.xlu1 %803  ;;  %v654_v58 = vld [vmem:[%s3429_s3 + $0x158] sm:$0xff] }
 0x1a9   :  { %1248 = vmatmul.f32.gmra.mxu2 %v615_v57  ;;  %v2835_v60 = vpop.f32.mrf.mxu1  ;;  %v692_v57 = vld [vmem:[%s3429_s3 + $0x288] sm:$0xff] }
 0x1aa   :  { %v607_v40 = vmax.f32 %v560_v28, 0.0 }
 0x1ac   :  { %1162 = vmatmul.f32.gmra.mxu1 %v665_v41  ;;  %v2900_v41 = vpop.permute.xlu0 %813  ;;  %v2913_v4 = vpop.permute.xlu2 %823 }
 0x1af   :  { %v562_v18 = vpop.f32.mrf.mxu0 }
 0x1b0   :  { %v563_v27 = vadd.f32 %v562_v18, %v298_v23  ;;  %v628_v18 = vld [vmem:[%s3429_s3 + $0x88] sm:$0xff] }
 0x1b1   :  { %1251 = vmatmul.f32.gmra.mxu2 %v618_v17  ;;  %v2848_v0 = vpop.f32.mrf.mxu1  ;;  %v645_v17 = vld [vmem:[%s3429_s3 + $0x110] sm:$0xff] }
 0x1b2   :  { %v608_v32 = vmax.f32 %v563_v27, 0.0  ;;  %v701_v27 = vld [vmem:[%s3429_s3 + $0x2d0] sm:$0xff] }
 0x1b4   :  { %1165 = vmatmul.f32.gmra.mxu1 %v668_v36 }
 0x1b7   :  { %v565_v26 = vpop.f32.mrf.mxu0 }
 0x1b8   :  { %v566_v24 = vadd.f32 %v565_v26, %v303_v22  ;;  %v2918_v26 = vpop.permute.xlu0 %828  ;;  %v698_v22 = vld [vmem:[%s3429_s3 + $0x2b8] sm:$0xff] }
 0x1b9   :  { %1254 = vmatmul.f32.gmra.mxu2 %v621_v31  ;;  %v2866_v9 = vpop.f32.mrf.mxu1  ;;  %v2916_v31 = vpop.permute.xlu1 %818 }
 0x1ba   :  { %v609_v6 = vmax.f32 %v566_v24, 0.0  ;;  %v651_v24 = vld [vmem:[%s3429_s3 + $0x140] sm:$0xff] }
 0x1bc   :  { %1168 = vmatmul.f32.gmra.mxu1 %v671_v3  ;;  %v631_v3 = vld [vmem:[%s3429_s3 + $0xa0] sm:$0xff] }
 0x1bf   :  { %v568_v5 = vpop.f32.mrf.mxu0 }
 0x1c0   :  { %v569_v25 = vadd.f32 %v568_v5, %v308_v56  ;;  %v648_v56 = vld [vmem:[%s3429_s3 + $0x128] sm:$0xff] }
 0x1c1   :  { %1257 = vmatmul.f32.gmra.mxu2 %v624_v21  ;;  %v2887_v52 = vpop.f32.mrf.mxu1  ;;  %v2932_v21 = vpop.permute.xlu2 %838 }
 0x1c2   :  { %v610_v11 = vmax.f32 %v569_v25, 0.0  ;;  %v2934_v5 = vpop.permute.xlu1 %833  ;;  %v2939_v25 = vpop.permute.xlu0 %843 }
 0x1c4   :  { %1171 = vmatmul.f32.gmra.mxu1 %v674_v16  ;;  %1374 = vmatpush.msra.mxu3 %v610_v11  ;;  %v634_v16 = vld [vmem:[%s3429_s3 + $0xb8] sm:$0xff] }
 0x1c6   :  { %1375 = vmatpush.msra.mxu3 %v609_v6 }
 0x1c8   :  { %1376 = vmatpush.msra.mxu3 %v608_v32 }
 0x1c9   :  { %1260 = vmatmul.f32.gmra.mxu2 %v627_v33  ;;  %v2911_v36 = vpop.f32.mrf.mxu1  ;;  %v2953_v28 = vpop.permute.xlu2 %853  ;;  %v657_v33 = vld [vmem:[%s3429_s3 + $0x170] sm:$0xff] }
 0x1ca   :  { %1377 = vmatpush.msra.mxu3 %v607_v40  ;;  %v2955_v6 = vpop.permute.xlu1 %848  ;;  %v2963_v32 = vpop.permute.xlu0 %858 }
 0x1cc   :  { %1174 = vmatmul.f32.gmra.mxu1 %v677_v42  ;;  %1378 = vmatpush.msra.mxu3 %v606_v44  ;;  %v707_v42 = vld [vmem:[%s3429_s3 + $0x300] sm:$0xff] }
 0x1ce   :  { %1379 = vmatpush.msra.mxu3 %v605_v49  ;;  %v643_v49 = vld [vmem:[%s3429_s3 + $0x100] sm:$0xff] }
 0x1d0   :  { %1380 = vmatpush.msra.mxu3 %v604_v50  ;;  %v710_v50 = vld [vmem:[%s3429_s3 + $0x318] sm:$0xff] }
 0x1d1   :  { %1263 = vmatmul.f32.gmra.mxu2 %v630_v51  ;;  %v2930_v23 = vpop.f32.mrf.mxu1  ;;  %v2974_v40 = vpop.permute.xlu2 %868 }
 0x1d2   :  { %1381 = vmatpush.msra.mxu3 %v603_v53  ;;  %v2979_v43 = vpop.permute.xlu1 %863  ;;  %v2982_v44 = vpop.permute.xlu0 %873 }
 0x1d3   :  { %1976 = vmatmul.msk.f32.vlgmr.msra.gmra.mxu3 %vm971_vm1, %v613_v55 }
 0x1d4   :  { %1177 = vmatmul.f32.gmra.mxu1 %v680_v39 }
 0x1d9   :  { %1266 = vmatmul.f32.gmra.mxu2 %v633_v62  ;;  %v2948_v11 = vpop.f32.mrf.mxu1  ;;  %v2995_v53 = vpop.permute.xlu2 %883 }
 0x1da   :  { %v2998_v55 = vpop.permute.xlu1 %878  ;;  %v3002_v62 = vpop.permute.xlu0 %888 }
 0x1db   :  { %1977 = vmatmul.msk.f32.gmra.mxu3 %vm971_vm1, %v616_v63  ;;  %v663_v63 = vld [vmem:[%s3429_s3 + $0x1a0] sm:$0xff] }
 0x1dc   :  { %1180 = vmatmul.f32.gmra.mxu1 %v683_v2  ;;  %v646_v2 = vld [vmem:[%s3429_s3 + $0x118] sm:$0xff] }
 0x1e1   :  { %1269 = vmatmul.f32.gmra.mxu2 %v636_v7  ;;  %v2969_v34 = vpop.f32.mrf.mxu1  ;;  %v713_v7 = vld [vmem:[%s3429_s3 + $0x330] sm:$0xff] }
 0x1e3   :  { %1978 = vmatmul.msk.f32.gmra.mxu3 %vm971_vm1, %v619_v59 }
 0x1e4   :  { %1183 = vmatmul.f32.gmra.mxu1 %v686_v38 }
 0x1e9   :  { %1272 = vmatmul.f32.gmra.mxu2 %v639_v14  ;;  %v2993_v51 = vpop.f32.mrf.mxu1  ;;  %v3018_v14 = vpop.permute.xlu2 %898 }
 0x1eb   :  { %1979 = vmatmul.msk.f32.gmra.mxu3 %vm971_vm1, %v622_v61  ;;  %v3020_v61 = vpop.permute.xlu1 %893 }
 0x1ec   :  { %1186 = vmatmul.f32.gmra.mxu1 %v689_v10  ;;  %v666_v10 = vld [vmem:[%s3429_s3 + $0x1b8] sm:$0xff] }
 0x1f1   :  { %1275 = vmatmul.f32.gmra.mxu2 %v642_v20  ;;  %v3014_v59 = vpop.f32.mrf.mxu1  ;;  %v3025_v20 = vpop.permute.xlu0 %903 }
 0x1f3   :  { %1980 = vmatmul.msk.f32.gmra.mxu3 %vm971_vm1, %v625_v12  ;;  %v649_v12 = vld [vmem:[%s3429_s3 + $0x130] sm:$0xff] }
 0x1f4   :  { %1189 = vmatmul.f32.gmra.mxu1 %v692_v57  ;;  %v716_v57 = vld [vmem:[%s3429_s3 + $0x348] sm:$0xff] }
 0x1f9   :  { %1278 = vmatmul.f32.gmra.mxu2 %v645_v17 }
 0x1fb   :  { %1981 = vmatmul.msk.f32.gmra.mxu3 %vm971_vm1, %v628_v18  ;;  %v3036_v18 = vpop.f32.mrf.mxu1 }
 0x1fc   :  { %1192 = vmatmul.f32.gmra.mxu1 %v695_v19  ;;  %v669_v19 = vld [vmem:[%s3429_s3 + $0x1d0] sm:$0xff] }
 0x201   :  { %1281 = vmatmul.f32.gmra.mxu2 %v648_v56  ;;  %v3041_v56 = vpop.permute.xlu2 %913 }
 0x203   :  { %1982 = vmatmul.msk.f32.gmra.mxu3 %vm971_vm1, %v631_v3  ;;  %v3043_v3 = vpop.permute.xlu1 %908 }
 0x204   :  { %1195 = vmatmul.f32.gmra.mxu1 %v698_v22  ;;  %v652_v22 = vld [vmem:[%s3429_s3 + $0x148] sm:$0xff] }
 0x209   :  { %1284 = vmatmul.f32.gmra.mxu2 %v651_v24  ;;  %v719_v24 = vld [vmem:[%s3429_s3 + $0x360] sm:$0xff] }
 0x20b   :  { %1983 = vmatmul.msk.f32.gmra.mxu3 %vm971_vm1, %v634_v16  ;;  %v3051_v16 = vpop.permute.xlu0 %918 }
 0x20c   :  { %1198 = vmatmul.f32.gmra.mxu1 %v701_v27 }
 0x211   :  { %1287 = vmatmul.f32.gmra.mxu2 %v654_v58  ;;  %v672_v58 = vld [vmem:[%s3429_s3 + $0x1e8] sm:$0xff] }
 0x213   :  { %1984 = vmatmul.msk.f32.gmra.mxu3 %vm971_vm1, %v637_v48  ;;  %v3059_v48 = vpop.f32.mrf.mxu1 }
 0x214   :  { %1201 = vmatmul.f32.gmra.mxu1 %v704_v29  ;;  %v655_v29 = vld [vmem:[%s3429_s3 + $0x160] sm:$0xff] }
 0x219   :  { %1290 = vmatmul.f32.gmra.mxu2 %v657_v33  ;;  %v3064_v33 = vpop.permute.xlu2 %928 }
 0x21a   :  { %3434 = vst [vmem:[#allocation6_spill] sm:$0xff] %v3064_v33 }
 0x21b   :  { %1985 = vmatmul.msk.f32.gmra.mxu3 %vm971_vm1, %v640_v35  ;;  %v722_v35 = vld [vmem:[%s3429_s3 + $0x378] sm:$0xff] }
 0x21c   :  { %1204 = vmatmul.f32.gmra.mxu1 %v707_v42  ;;  %v3069_v42 = vpop.permute.xlu1 %923 }
 0x221   :  { %1293 = vmatmul.f32.gmra.mxu2 %v660_v47  ;;  %v3072_v47 = vpop.permute.xlu0 %933 }
 0x222   :  { %3435 = vst [vmem:[#allocation7_spill] sm:$0xff] %v3072_v47 }
 0x223   :  { %1986 = vmatmul.msk.f32.gmra.mxu3 %vm971_vm1, %v643_v49 }
 0x224   :  { %1207 = vmatmul.f32.gmra.mxu1 %v710_v50  ;;  %v3000_v39 = vpop.f32.mrf.mxu2  ;;  %v675_v50 = vld [vmem:[%s3429_s3 + $0x200] sm:$0xff] }
 0x229   :  { %1296 = vmatmul.f32.gmra.mxu2 %v663_v63  ;;  %v658_v63 = vld [vmem:[%s3429_s3 + $0x178] sm:$0xff] }
 0x22b   :  { %1987 = vmatmul.msk.f32.gmra.mxu3 %vm971_vm1, %v646_v2  ;;  %v725_v2 = vld [vmem:[%s3429_s3 + $0x390] sm:$0xff] }
 0x22c   :  { %1210 = vmatmul.f32.gmra.mxu1 %v713_v7  ;;  %v3016_v38 = vpop.f32.mrf.mxu2  ;;  %v3085_v7 = vpop.f32.mrf.mxu1 }
 0x231   :  { %1299 = vmatmul.f32.gmra.mxu2 %v666_v10  ;;  %v3087_v10 = vpop.permute.xlu2 %943 }
 0x232   :  { %3436 = vst [vmem:[#allocation8_spill] sm:$0xff] %v3087_v10 }
 0x233   :  { %1988 = vmatmul.msk.f32.gmra.mxu3 %vm971_vm1, %v649_v12  ;;  %v3090_v12 = vpop.permute.xlu1 %938 }
 0x234   :  { %1213 = vmatmul.f32.gmra.mxu1 %v716_v57  ;;  %v3034_v17 = vpop.f32.mrf.mxu2  ;;  %3437 = vst [vmem:[#allocation9_spill] sm:$0xff] %v3090_v12 }
 0x239   :  { %1302 = vmatmul.f32.gmra.mxu2 %v669_v19  ;;  %v3094_v19 = vpop.permute.xlu0 %948 }
 0x23a   :  { %3438 = vst [vmem:[#allocation10_spill] sm:$0xff] %v3094_v19 }
 0x23b   :  { %1989 = vmatmul.msk.f32.gmra.mxu3 %vm971_vm1, %v652_v22  ;;  %v678_v22 = vld [vmem:[%s3429_s3 + $0x218] sm:$0xff]  ;;  %v3114_v10 = vpop.permute.xlu1 %953 }
 0x23c   :  { %1216 = vmatmul.f32.gmra.mxu1 %v719_v24  ;;  %v3054_v27 = vpop.f32.mrf.mxu2  ;;  %v1109_v24 = vpop.f32.mrf.mxu0  ;;  %3440 = vst [vmem:[#allocation12_spill] sm:$0xff] %v3114_v10 }
 0x241   :  { %1305 = vmatmul.f32.gmra.mxu2 %v672_v58  ;;  %v661_v58 = vld [vmem:[%s3429_s3 + $0x190] sm:$0xff] }
 0x243   :  { %1990 = vmatmul.msk.f32.gmra.mxu3 %vm971_vm1, %v655_v29  ;;  %v728_v29 = vld [vmem:[%s3429_s3 + $0x3a8] sm:$0xff]  ;;  %v3133_v10 = vpop.permute.xlu1 %968 }
 0x244   :  { %1219 = vmatmul.f32.gmra.mxu1 %v722_v35  ;;  %v3074_v49 = vpop.f32.mrf.mxu2  ;;  %v1110_v35 = vadd.f32 %v1109_v24, %v2852_v54  ;;  %v3119_v54 = vpop.permute.xlu0 %963  ;;  %v664_v24 = vld [vmem:[%s3429_s3 + $0x1a8] sm:$0xff]  ;;  %3442 = vst [vmem:[#allocation14_spill] sm:$0xff] %v3133_v10 }
 0x245   :  { %3441 = vst [vmem:[#allocation13_spill] sm:$0xff] %v3119_v54 }
 0x246   :  { %v1247_v19 = vadd.f32 %v3000_v39, %v1110_v35 }
 0x249   :  { %1308 = vmatmul.f32.gmra.mxu2 %v675_v50  ;;  %v3107_v50 = vpop.f32.mrf.mxu1 }
 0x24b   :  { %1991 = vmatmul.msk.f32.gmra.mxu3 %vm971_vm1, %v658_v63 }
 0x24c   :  { %1222 = vmatmul.f32.gmra.mxu1 %v725_v2  ;;  %v3092_v57 = vpop.f32.mrf.mxu2  ;;  %v3111_v2 = vpop.permute.xlu2 %958 }
 0x24d   :  { %3439 = vst [vmem:[#allocation11_spill] sm:$0xff] %v3111_v2 }
 0x251   :  { %1311 = vmatmul.f32.gmra.mxu2 %v678_v22  ;;  %v681_v22 = vld [vmem:[%s3429_s3 + $0x230] sm:$0xff] }
 0x253   :  { %1992 = vmatmul.msk.f32.gmra.mxu3 %vm971_vm1, %v661_v58  ;;  %v1113_v58 = vadd.f32 %v2819_v37, %v2850_v1  ;;  %v667_v37 = vld [vmem:[%s3429_s3 + $0x1c0] sm:$0xff] }
 0x254   :  { %1225 = vmatmul.f32.gmra.mxu1 %v728_v29  ;;  %v3109_v63 = vpop.f32.mrf.mxu2  ;;  %v1586_v54 = vpop.permute.xlu2 %1585 }
 0x255   :  { %v1250_v29 = vadd.f32 %v3016_v38, %v1113_v58  ;;  %v1116_v38 = vadd.f32 %v2835_v60, %v2857_v45  ;;  %v670_v60 = vld [vmem:[%s3429_s3 + $0x1d8] sm:$0xff] }
 0x256   :  { %v1383_v12 = vpop.f32.mrf.mxu3 }
 0x257   :  { %v1384_v47 = vadd.f32 %v1383_v12, %v1247_v19  ;;  %v684_v12 = vld [vmem:[%s3429_s3 + $0x248] sm:$0xff] }
 0x259   :  { %1314 = vmatmul.f32.gmra.mxu2 %v681_v22  ;;  %v1503_v35 = vmax.f32 %v1384_v47, 0.0 }
 0x25b   :  { %1993 = vmatmul.msk.f32.gmra.mxu3 %vm971_vm1, %v664_v24  ;;  %v1783_v1 = vmul.f32 %v1586_v54, %v1503_v35  ;;  %v1591_v24 = vpop.permute.xlu0 %1590  ;;  %v687_v35 = vld [vmem:[%s3429_s3 + $0x260] sm:$0xff] }
 0x25c   :  { %v3127_v39 = vpop.f32.mrf.mxu2 }
 0x25e   :  { %v1386_v2 = vpop.f32.mrf.mxu3 }
 0x25f   :  { %v1387_v19 = vadd.f32 %v1386_v2, %v1250_v29  ;;  %v1253_v2 = vadd.f32 %v3034_v17, %v1116_v38  ;;  %v1824_v29 = vsel %vm1823_vm2, %v1783_v1, 0.0  ;;  %v1119_v17 = vadd.f32 %v2848_v0, %v2873_v30  ;;  %v673_v0 = vld [vmem:[%s3429_s3 + $0x1f0] sm:$0xff] }
 0x261   :  { %v1504_v22 = vmax.f32 %v1387_v19, 0.0  ;;  %1317 = vmatmul.f32.gmra.mxu2 %v684_v12  ;;  %v1596_v19 = vpop.permute.xlu1 %1595  ;;  %v1256_v1 = vadd.f32 %v3054_v27, %v1119_v17 }
 0x263   :  { %v1784_v47 = vmul.f32 %v1591_v24, %v1504_v22  ;;  %1994 = vmatmul.msk.f32.gmra.mxu3 %vm971_vm1, %v667_v37 }
 0x264   :  { %v3141_v58 = vpop.f32.mrf.mxu2 }
 0x265   :  { %v1825_v10 = vsel %vm1823_vm2, %v1784_v47, 0.0  ;;  %v690_v47 = vld [vmem:[%s3429_s3 + $0x278] sm:$0xff] }
 0x266   :  { %v1826_v33 = vadd.f32 %v1825_v10, %v1824_v29  ;;  %v1389_v54 = vpop.f32.mrf.mxu3  ;;  %v1601_v29 = vpop.permute.xlu2 %1600 }
 0x267   :  { %v1390_v12 = vadd.f32 %v1389_v54, %v1253_v2  ;;  %v1122_v54 = vadd.f32 %v2866_v9, %v2871_v13  ;;  %v676_v9 = vld [vmem:[%s3429_s3 + $0x208] sm:$0xff] }
 0x269   :  { %v1505_v45 = vmax.f32 %v1390_v12, 0.0  ;;  %1320 = vmatmul.f32.gmra.mxu2 %v687_v35  ;;  %v1259_v35 = vadd.f32 %v3074_v49, %v1122_v54  ;;  %v1128_v54 = vadd.f32 %v2911_v36, %v2897_v8  ;;  %v682_v8 = vld [vmem:[%s3429_s3 + $0x238] sm:$0xff] }
 0x26b   :  { %v1785_v37 = vmul.f32 %v1596_v19, %v1505_v45  ;;  %1995 = vmatmul.msk.f32.gmra.mxu3 %vm971_vm1, %v670_v60  ;;  %v693_v19 = vld [vmem:[%s3429_s3 + $0x290] sm:$0xff] }
 0x26c   :  { %v3155_v10 = vpop.f32.mrf.mxu2 }
 0x26d   :  { %v1827_v22 = vsel %vm1823_vm2, %v1785_v37, 0.0  ;;  %v1606_v37 = vpop.permute.xlu0 %1605 }
 0x26e   :  { %v1828_v24 = vadd.f32 %v1827_v22, %v1826_v33  ;;  %v1392_v38 = vpop.f32.mrf.mxu3 }
 0x26f   :  { %v1393_v2 = vadd.f32 %v1392_v38, %v1256_v1  ;;  %v1125_v1 = vadd.f32 %v2887_v52, %v2881_v15  ;;  %v679_v15 = vld [vmem:[%s3429_s3 + $0x220] sm:$0xff] }
 0x271   :  { %v1506_v30 = vmax.f32 %v1393_v2, 0.0  ;;  %1323 = vmatmul.f32.gmra.mxu2 %v690_v47 }
 0x273   :  { %v1786_v27 = vmul.f32 %v1601_v29, %v1506_v30  ;;  %1996 = vmatmul.msk.f32.gmra.mxu3 %vm971_vm1, %v673_v0  ;;  %v696_v0 = vld [vmem:[%s3429_s3 + $0x2a8] sm:$0xff]  ;;  %v1611_v29 = vpop.permute.xlu1 %1610 }
 0x274   :  { %v3168_v33 = vpop.f32.mrf.mxu2 }
 0x275   :  { %v1829_v12 = vsel %vm1823_vm2, %v1786_v27, 0.0 }
 0x276   :  { %v1830_v60 = vadd.f32 %v1829_v12, %v1828_v24  ;;  %v1395_v45 = vpop.f32.mrf.mxu3  ;;  %v1262_v24 = vadd.f32 %v3092_v57, %v1125_v1 }
 0x277   :  { %v1396_v17 = vadd.f32 %v1395_v45, %v1259_v35  ;;  %v1265_v35 = vadd.f32 %v3109_v63, %v1128_v54  ;;  %v1131_v63 = vadd.f32 %v2930_v23, %v2892_v46  ;;  %v685_v46 = vld [vmem:[%s3429_s3 + $0x250] sm:$0xff] }
 0x279   :  { %v1507_v13 = vmax.f32 %v1396_v17, 0.0  ;;  %1326 = vmatmul.f32.gmra.mxu2 %v693_v19  ;;  %v699_v19 = vld [vmem:[%s3429_s3 + $0x2c0] sm:$0xff] }
 0x27b   :  { %v1787_v49 = vmul.f32 %v1606_v37, %v1507_v13  ;;  %1997 = vmatmul.msk.f32.gmra.mxu3 %vm971_vm1, %v676_v9  ;;  %v1157_v9 = vpop.f32.mrf.mxu1  ;;  %v1616_v13 = vpop.permute.xlu2 %1615 }
 0x27c   :  { %v3181_v22 = vpop.f32.mrf.mxu2 }
 0x27d   :  { %v1831_v38 = vsel %vm1823_vm2, %v1787_v49, 0.0  ;;  %v1268_v49 = vadd.f32 %v3127_v39, %v1131_v63  ;;  %v1134_v39 = vadd.f32 %v2948_v11, %v2900_v41  ;;  %v688_v41 = vld [vmem:[%s3429_s3 + $0x268] sm:$0xff] }
 0x27e   :  { %v1832_v47 = vadd.f32 %v1831_v38, %v1830_v60  ;;  %v1398_v2 = vpop.f32.mrf.mxu3 }
 0x27f   :  { %v1399_v30 = vadd.f32 %v1398_v2, %v1262_v24  ;;  %v702_v2 = vld [vmem:[%s3429_s3 + $0x2d8] sm:$0xff]  ;;  %v1271_v54 = vadd.f32 %v3141_v58, %v1134_v39 }
 0x281   :  { %v1508_v52 = vmax.f32 %v1399_v30, 0.0  ;;  %1329 = vmatmul.f32.gmra.mxu2 %v696_v0  ;;  %v1621_v30 = vpop.permute.xlu0 %1620 }
 0x283   :  { %v1788_v57 = vmul.f32 %v1611_v29, %v1508_v52  ;;  %1998 = vmatmul.msk.f32.gmra.mxu3 %vm971_vm1, %v679_v15  ;;  %v1160_v15 = vpop.f32.mrf.mxu1 }
 0x284   :  { %v3194_v27 = vpop.f32.mrf.mxu2 }
 0x285   :  { %v1833_v12 = vsel %vm1823_vm2, %v1788_v57, 0.0 }
 0x286   :  { %v1834_v60 = vadd.f32 %v1833_v12, %v1832_v47  ;;  %v1401_v45 = vpop.f32.mrf.mxu3 }
 0x287   :  { %v1402_v17 = vadd.f32 %v1401_v45, %v1265_v35 }
 0x289   :  { %v1509_v36 = vmax.f32 %v1402_v17, 0.0  ;;  %1332 = vmatmul.f32.gmra.mxu2 %v699_v19  ;;  %v1626_v19 = vpop.permute.xlu1 %1625  ;;  %v1137_v17 = vadd.f32 %v2969_v34, %v2916_v31  ;;  %v691_v31 = vld [vmem:[%s3429_s3 + $0x280] sm:$0xff] }
 0x28b   :  { %v1789_v37 = vmul.f32 %v1616_v13, %v1509_v36  ;;  %1999 = vmatmul.msk.f32.gmra.mxu3 %vm971_vm1, %v682_v8  ;;  %v1163_v8 = vpop.f32.mrf.mxu1  ;;  %v1274_v13 = vadd.f32 %v3155_v10, %v1137_v17  ;;  %v1158_v10 = vadd.f32 %v1157_v9, %v2953_v28  ;;  %v694_v28 = vld [vmem:[%s3429_s3 + $0x298] sm:$0xff]  ;;  %v1636_v9 = vpop.permute.xlu0 %1635 }
 0x28c   :  { %v3207_v1 = vpop.f32.mrf.mxu2 }
 0x28d   :  { %v1835_v24 = vsel %vm1823_vm2, %v1789_v37, 0.0 }
 0x28e   :  { %v1836_v38 = vadd.f32 %v1835_v24, %v1834_v60  ;;  %v1404_v47 = vpop.f32.mrf.mxu3  ;;  %v705_v60 = vld [vmem:[%s3429_s3 + $0x2f0] sm:$0xff]  ;;  %v708_v24 = vld [vmem:[%s3429_s3 + $0x308] sm:$0xff] }
 0x28f   :  { %v1405_v0 = vadd.f32 %v1404_v47, %v1268_v49  ;;  %v1631_v47 = vpop.permute.xlu2 %1630 }
 0x291   :  { %v1510_v23 = vmax.f32 %v1405_v0, 0.0  ;;  %1335 = vmatmul.f32.gmra.mxu2 %v702_v2  ;;  %v1140_v2 = vadd.f32 %v2993_v51, %v2913_v4 }
 0x293   :  { %v1790_v52 = vmul.f32 %v1621_v30, %v1510_v23  ;;  %2000 = vmatmul.msk.f32.gmra.mxu3 %vm971_vm1, %v685_v46  ;;  %v1277_v23 = vadd.f32 %v3168_v33, %v1140_v2  ;;  %v1143_v33 = vadd.f32 %v3014_v59, %v2918_v26 }
 0x294   :  { %v3220_v29 = vpop.f32.mrf.mxu2 }
 0x295   :  { %v1837_v57 = vsel %vm1823_vm2, %v1790_v52, 0.0  ;;  %v1166_v52 = vpop.f32.mrf.mxu1 }
 0x296   :  { %v1838_v35 = vadd.f32 %v1837_v57, %v1836_v38  ;;  %v1407_v12 = vpop.f32.mrf.mxu3 }
 0x297   :  { %v1408_v45 = vadd.f32 %v1407_v12, %v1271_v54  ;;  %v1161_v12 = vadd.f32 %v1160_v15, %v2963_v32  ;;  %v697_v32 = vld [vmem:[%s3429_s3 + $0x2b0] sm:$0xff]  ;;  %v1641_v15 = vpop.permute.xlu1 %1640 }
 0x299   :  { %v1511_v11 = vmax.f32 %v1408_v45, 0.0  ;;  %1338 = vmatmul.f32.gmra.mxu2 %v705_v60 }
 0x29b   :  { %v1791_v58 = vmul.f32 %v1626_v19, %v1511_v11  ;;  %2001 = vmatmul.msk.f32.gmra.mxu3 %vm971_vm1, %v688_v41  ;;  %v1280_v41 = vadd.f32 %v3181_v22, %v1143_v33  ;;  %v1146_v22 = vadd.f32 %v3036_v18, %v2934_v5  ;;  %v700_v5 = vld [vmem:[%s3429_s3 + $0x2c8] sm:$0xff]  ;;  %v1646_v18 = vpop.permute.xlu2 %1645 }
 0x29c   :  { %v3233_v36 = vpop.f32.mrf.mxu2 }
 0x29d   :  { %v1839_v63 = vsel %vm1823_vm2, %v1791_v58, 0.0  ;;  %v1169_v26 = vpop.f32.mrf.mxu1 }
 0x29e   :  { %v1840_v37 = vadd.f32 %v1839_v63, %v1838_v35  ;;  %v1410_v49 = vpop.f32.mrf.mxu3  ;;  %v711_v35 = vld [vmem:[%s3429_s3 + $0x320] sm:$0xff] }
 0x29f   :  { %v1411_v38 = vadd.f32 %v1410_v49, %v1274_v13  ;;  %v714_v13 = vld [vmem:[%s3429_s3 + $0x338] sm:$0xff] }
 0x2a1   :  { %v1512_v34 = vmax.f32 %v1411_v38, 0.0  ;;  %1341 = vmatmul.f32.gmra.mxu2 %v708_v24  ;;  %v1283_v38 = vadd.f32 %v3194_v27, %v1146_v22  ;;  %v1149_v27 = vadd.f32 %v3059_v48, %v2932_v21  ;;  %v703_v21 = vld [vmem:[%s3429_s3 + $0x2e0] sm:$0xff]  ;;  %v1651_v48 = vpop.permute.xlu0 %1650 }
 0x2a3   :  { %v1792_v0 = vmul.f32 %v1631_v47, %v1512_v34  ;;  %2002 = vmatmul.msk.f32.gmra.mxu3 %vm971_vm1, %v691_v31 }
 0x2a4   :  { %v1294_v46 = vpop.f32.mrf.mxu2 }
 0x2a5   :  { %v1841_v30 = vsel %vm1823_vm2, %v1792_v0, 0.0  ;;  %v3249_v39 = vadd.f32 %v1294_v46, %v1158_v10  ;;  %v717_v10 = vld [vmem:[%s3429_s3 + $0x350] sm:$0xff]  ;;  %v1167_v46 = vadd.f32 %v1166_v52, %v2974_v40  ;;  %v1170_v52 = vadd.f32 %v1169_v26, %v2982_v44  ;;  %v706_v44 = vld [vmem:[%s3429_s3 + $0x2f8] sm:$0xff] }
 0x2a6   :  { %v1842_v54 = vadd.f32 %v1841_v30, %v1840_v37  ;;  %v1413_v57 = vpop.f32.mrf.mxu3  ;;  %v1164_v37 = vadd.f32 %v1163_v8, %v2979_v43  ;;  %v1172_v8 = vpop.f32.mrf.mxu1 }
 0x2a7   :  { %v1414_v4 = vadd.f32 %v1413_v57, %v1277_v23  ;;  %v1173_v26 = vadd.f32 %v1172_v8, %v2998_v55  ;;  %v709_v55 = vld [vmem:[%s3429_s3 + $0x310] sm:$0xff] }
 0x2a8   :  { %v729_v8 = vld [vmem:[%s3429_s3 + $0x3b0] sm:$0xff] }
 0x2a9   :  { %v1513_v51 = vmax.f32 %v1414_v4, 0.0  ;;  %1344 = vmatmul.f32.gmra.mxu2 %v711_v35 }
 0x2ab   :  { %v1793_v60 = vmul.f32 %v1636_v9, %v1513_v51  ;;  %2003 = vmatmul.msk.f32.gmra.mxu3 %vm971_vm1, %v694_v28  ;;  %v720_v51 = vld [vmem:[%s3429_s3 + $0x368] sm:$0xff] }
 0x2ac   :  { %v1297_v45 = vpop.f32.mrf.mxu2 }
 0x2ad   :  { %v1843_v11 = vsel %vm1823_vm2, %v1793_v60, 0.0  ;;  %v3263_v19 = vadd.f32 %v1297_v45, %v1161_v12 }
 0x2ae   :  { %v1844_v17 = vadd.f32 %v1843_v11, %v1842_v54  ;;  %v1416_v58 = vpop.f32.mrf.mxu3  ;;  %v1286_v54 = vadd.f32 %v3207_v1, %v1149_v27  ;;  %v1152_v1 = vadd.f32 %v3085_v7, %v2939_v25  ;;  %v1175_v12 = vpop.f32.mrf.mxu1 }
 0x2af   :  { %v1417_v63 = vadd.f32 %v1416_v58, %v1280_v41 }
 0x2b0   :  { %v1289_v45 = vadd.f32 %v3220_v29, %v1152_v1  ;;  %v1155_v29 = vadd.f32 %v3107_v50, %v2955_v6 }
 0x2b1   :  { %v1514_v59 = vmax.f32 %v1417_v63, 0.0  ;;  %1347 = vmatmul.f32.gmra.mxu2 %v714_v13  ;;  %v723_v13 = vld [vmem:[%s3429_s3 + $0x380] sm:$0xff]  ;;  %v1656_v63 = vpop.permute.xlu1 %1655 }
 0x2b3   :  { %v1794_v49 = vmul.f32 %v1641_v15, %v1514_v59  ;;  %2004 = vmatmul.msk.f32.gmra.mxu3 %vm971_vm1, %v697_v32  ;;  %v1292_v15 = vadd.f32 %v3233_v36, %v1155_v29  ;;  %v1176_v36 = vadd.f32 %v1175_v12, %v2995_v53  ;;  %v712_v53 = vld [vmem:[%s3429_s3 + $0x328] sm:$0xff] }
 0x2b4   :  { %v1300_v24 = vpop.f32.mrf.mxu2 }
 0x2b5   :  { %v1845_v31 = vsel %vm1823_vm2, %v1794_v49, 0.0  ;;  %v3277_v34 = vadd.f32 %v1300_v24, %v1164_v37 }
 0x2b6   :  { %v1846_v47 = vadd.f32 %v1845_v31, %v1844_v17  ;;  %v1419_v2 = vpop.f32.mrf.mxu3  ;;  %v1178_v49 = vpop.f32.mrf.mxu1  ;;  %v726_v31 = vld [vmem:[%s3429_s3 + $0x398] sm:$0xff] }
 0x2b7   :  { %v1420_v0 = vadd.f32 %v1419_v2, %v1283_v38 }
 0x2b9   :  { %v1515_v43 = vmax.f32 %v1420_v0, 0.0  ;;  %1350 = vmatmul.f32.gmra.mxu2 %v717_v10  ;;  %v1671_v1 = vpop.permute.xlu1 %1670 }
 0x2bb   :  { %v1795_v23 = vmul.f32 %v1646_v18, %v1515_v43  ;;  %2005 = vmatmul.msk.f32.gmra.mxu3 %vm971_vm1, %v700_v5 }
 0x2bc   :  { %v1303_v30 = vpop.f32.mrf.mxu2 }
 0x2bd   :  { %v1847_v57 = vsel %vm1823_vm2, %v1795_v23, 0.0  ;;  %v3291_v35 = vadd.f32 %v1303_v30, %v1167_v46  ;;  %v1666_v30 = vpop.permute.xlu0 %1665 }
 0x2be   :  { %v1848_v4 = vadd.f32 %v1847_v57, %v1846_v47  ;;  %v1422_v28 = vpop.f32.mrf.mxu3  ;;  %v1661_v47 = vpop.permute.xlu2 %1660 }
 0x2bf   :  { %v1423_v9 = vadd.f32 %v1422_v28, %v1286_v54  ;;  %v1181_v46 = vpop.f32.mrf.mxu1  ;;  %v1179_v54 = vadd.f32 %v1178_v49, %v3002_v62 }
 0x2c0   :  { %v1182_v62 = vadd.f32 %v1181_v46, %v3020_v61 }
 0x2c1   :  { %v1516_v40 = vmax.f32 %v1423_v9, 0.0  ;;  %1353 = vmatmul.f32.gmra.mxu2 %v720_v51 }
 0x2c3   :  { %v1796_v33 = vmul.f32 %v1651_v48, %v1516_v40  ;;  %2006 = vmatmul.msk.f32.gmra.mxu3 %vm971_vm1, %v703_v21  ;;  %v715_v40 = vld [vmem:[%s3429_s3 + $0x340] sm:$0xff] }
 0x2c4   :  { %v1306_v60 = vpop.f32.mrf.mxu2 }
 0x2c5   :  { %v1849_v41 = vsel %vm1823_vm2, %v1796_v33, 0.0  ;;  %v3305_v11 = vadd.f32 %v1306_v60, %v1170_v52  ;;  %v1681_v49 = vpop.permute.xlu0 %1680 }
 0x2c6   :  { %v1850_v17 = vadd.f32 %v1849_v41, %v1848_v4  ;;  %v1425_v58 = vpop.f32.mrf.mxu3 }
 0x2c7   :  { %v1426_v25 = vadd.f32 %v1425_v58, %v1289_v45  ;;  %v1184_v52 = vpop.f32.mrf.mxu1  ;;  %v718_v58 = vld [vmem:[%s3429_s3 + $0x358] sm:$0xff] }
 0x2c8   :  { %v1185_v61 = vadd.f32 %v1184_v52, %v3018_v14 }
 0x2c9   :  { %v1517_v7 = vmax.f32 %v1426_v25, 0.0  ;;  %1356 = vmatmul.f32.gmra.mxu2 %v723_v13  ;;  %v1676_v25 = vpop.permute.xlu2 %1675 }
 0x2cb   :  { %v1797_v32 = vmul.f32 %v1656_v63, %v1517_v7  ;;  %2007 = vmatmul.msk.f32.gmra.mxu3 %vm971_vm1, %v706_v44 }
 0x2cc   :  { %v1309_v59 = vpop.f32.mrf.mxu2 }
 0x2cd   :  { %v1851_v22 = vsel %vm1823_vm2, %v1797_v32, 0.0  ;;  %v3319_v37 = vadd.f32 %v1309_v59, %v1173_v26 }
 0x2ce   :  { %v1852_v24 = vadd.f32 %v1851_v22, %v1850_v17  ;;  %v1428_v38 = vpop.f32.mrf.mxu3 }
 0x2cf   :  { %v1429_v6 = vadd.f32 %v1428_v38, %v1292_v15  ;;  %v1187_v7 = vpop.f32.mrf.mxu1  ;;  %v721_v15 = vld [vmem:[%s3429_s3 + $0x370] sm:$0xff] }
 0x2d0   :  { %v1188_v14 = vadd.f32 %v1187_v7, %v3025_v20 }
 0x2d1   :  { %v1518_v50 = vmax.f32 %v1429_v6, 0.0  ;;  %1359 = vmatmul.f32.gmra.mxu2 %v726_v31 }
 0x2d3   :  { %v1798_v2 = vmul.f32 %v1661_v47, %v1518_v50  ;;  %2008 = vmatmul.msk.f32.gmra.mxu3 %vm971_vm1, %v709_v55 }
 0x2d4   :  { %v1312_v10 = vpop.f32.mrf.mxu2 }
 0x2d5   :  { %v1853_v0 = vsel %vm1823_vm2, %v1798_v2, 0.0  ;;  %v3330_v5 = vadd.f32 %v1312_v10, %v1176_v36  ;;  %v724_v36 = vld [vmem:[%s3429_s3 + $0x388] sm:$0xff]  ;;  %v1686_v10 = vpop.permute.xlu1 %1685 }
 0x2d6   :  { %v1854_v43 = vadd.f32 %v1853_v0, %v1852_v24  ;;  %v1431_v18 = vpop.f32.mrf.mxu3 }
 0x2d7   :  { %v1432_v27 = vadd.f32 %v1431_v18, %v3249_v39  ;;  %v1190_v55 = vpop.f32.mrf.mxu1 }
 0x2d8   :  { %v1191_v20 = vadd.f32 %v1190_v55, %v3043_v3 }
 0x2d9   :  { %v1519_v23 = vmax.f32 %v1432_v27, 0.0  ;;  %1362 = vmatmul.f32.gmra.mxu2 %v729_v8 }
 0x2db   :  { %v1799_v57 = vmul.f32 %v1666_v30, %v1519_v23  ;;  %2009 = vmatmul.msk.f32.gmra.mxu3 %vm971_vm1, %v712_v53  ;;  %v727_v23 = vld [vmem:[%s3429_s3 + $0x3a0] sm:$0xff] }
 0x2dc   :  { %v1315_v4 = vpop.f32.mrf.mxu2 }
 0x2dd   :  { %v1855_v28 = vsel %vm1823_vm2, %v1799_v57, 0.0  ;;  %v3342_v51 = vadd.f32 %v1315_v4, %v1179_v54  ;;  %v1691_v54 = vpop.permute.xlu2 %1690 }
 0x2de   :  { %v1856_v9 = vadd.f32 %v1855_v28, %v1854_v43  ;;  %v1434_v39 = vpop.f32.mrf.mxu3 }
 0x2df   :  { %v1435_v21 = vadd.f32 %v1434_v39, %v3263_v19 }
 0x2e1   :  { %v1520_v48 = vmax.f32 %v1435_v21, 0.0 }
 0x2e3   :  { %v1800_v33 = vmul.f32 %v1671_v1, %v1520_v48  ;;  %2010 = vmatmul.msk.f32.gmra.mxu3 %vm971_vm1, %v715_v40  ;;  %v730_v40 = vld [vmem:[%s3429_s3 + $0x3b8] sm:$0xff]  ;;  %v1696_v1 = vpop.permute.xlu0 %1695  ;;  %s2064_s3 = smov [#allocation3]  }
 0x2e4   :  { %v1318_v12 = vpop.f32.mrf.mxu2  ;;  %s1924_s18 = sshll.u32 %s2064_s3, 4  ;;  %s1925_s18 = int_to_ptr.vmem [resolvable:$true] %s1924_s18 }
 0x2e5   :  { %v1857_v60 = vsel %vm1823_vm2, %v1800_v33, 0.0  ;;  %v3351_v45 = vadd.f32 %v1318_v12, %v1182_v62 }
 0x2e6   :  { %v1858_v41 = vadd.f32 %v1857_v60, %v1856_v9  ;;  %v1437_v17 = vpop.f32.mrf.mxu3 }
 0x2e7   :  { %v1438_v19 = vadd.f32 %v1437_v17, %v3277_v34 }
 0x2e9   :  { %v1521_v13 = vmax.f32 %v1438_v19, 0.0 }
 0x2eb   :  { %v1801_v44 = vmul.f32 %v1676_v25, %v1521_v13  ;;  %2011 = vmatmul.msk.f32.gmra.mxu3 %vm971_vm1, %v718_v58 }
 0x2ec   :  { %v1321_v63 = vpop.f32.mrf.mxu2 }
 0x2ed   :  { %v1859_v29 = vsel %vm1823_vm2, %v1801_v44, 0.0  ;;  %v3360_v26 = vadd.f32 %v1321_v63, %v1185_v61  ;;  %v1706_v61 = vpop.permute.xlu2 %1705 }
 0x2ee   :  { %v1860_v32 = vadd.f32 %v1859_v29, %v1858_v41  ;;  %v1440_v59 = vpop.f32.mrf.mxu3  ;;  %v1701_v41 = vpop.permute.xlu1 %1700 }
 0x2ef   :  { %v1441_v34 = vadd.f32 %v1440_v59, %v3291_v35 }
 0x2f1   :  { %v1522_v22 = vmax.f32 %v1441_v34, 0.0 }
 0x2f3   :  { %v1802_v24 = vmul.f32 %v1681_v49, %v1522_v22  ;;  %2012 = vmatmul.msk.f32.gmra.mxu3 %vm971_vm1, %v721_v15 }
 0x2f4   :  { %v1324_v38 = vpop.f32.mrf.mxu2 }
 0x2f5   :  { %v1861_v31 = vsel %vm1823_vm2, %v1802_v24, 0.0  ;;  %v1325_v6 = vadd.f32 %v1324_v38, %v1188_v14 }
 0x2f6   :  { %v1862_v50 = vadd.f32 %v1861_v31, %v1860_v32  ;;  %v1443_v47 = vpop.f32.mrf.mxu3  ;;  %v1716_v31 = vpop.permute.xlu1 %1715 }
 0x2f7   :  { %v1444_v35 = vadd.f32 %v1443_v47, %v3305_v11  ;;  %v1193_v11 = vpop.f32.mrf.mxu1 }
 0x2f8   :  { %v1194_v3 = vadd.f32 %v1193_v11, %v3041_v56 }
 0x2f9   :  { %v1523_v2 = vmax.f32 %v1444_v35, 0.0 }
 0x2fb   :  { %v1803_v0 = vmul.f32 %v1686_v10, %v1523_v2  ;;  %2013 = vmatmul.msk.f32.gmra.mxu3 %vm971_vm1, %v724_v36 }
 0x2fc   :  { %v1327_v43 = vpop.f32.mrf.mxu2 }
 0x2fd   :  { %v1863_v18 = vsel %vm1823_vm2, %v1803_v0, 0.0  ;;  %v1328_v8 = vadd.f32 %v1327_v43, %v1191_v20  ;;  %v1721_v20 = vpop.permute.xlu2 %1720 }
 0x2fe   :  { %v1864_v27 = vadd.f32 %v1863_v18, %v1862_v50  ;;  %v1446_v46 = vpop.f32.mrf.mxu3 }
 0x2ff   :  { %v1447_v53 = vadd.f32 %v1446_v46, %v3319_v37  ;;  %v1196_v15 = vpop.f32.mrf.mxu1 }
 0x301   :  { %v1524_v30 = vmax.f32 %v1447_v53, 0.0 }
 0x303   :  { %v1804_v57 = vmul.f32 %v1691_v54, %v1524_v30  ;;  %2014 = vmatmul.msk.f32.gmra.mxu3 %vm971_vm1, %v727_v23 }
 0x304   :  { %v1330_v4 = vpop.f32.mrf.mxu2 }
 0x305   :  { %v1865_v28 = vsel %vm1823_vm2, %v1804_v57, 0.0  ;;  %v1331_v9 = vadd.f32 %v1330_v4, %v1194_v3 }
 0x306   :  { %v1866_v39 = vadd.f32 %v1865_v28, %v1864_v27  ;;  %v1449_v21 = vpop.f32.mrf.mxu3 }
 0x307   :  { %v1450_v37 = vadd.f32 %v1449_v21, %v3330_v5  ;;  %v1199_v47 = vpop.f32.mrf.mxu1 }
 0x309   :  { %v1525_v48 = vmax.f32 %v1450_v37, 0.0 }
 0x30b   :  { %v1805_v52 = vmul.f32 %v1696_v1, %v1525_v48  ;;  %2015 = vmatmul.msk.f32.gmra.mxu3 %vm971_vm1, %v730_v40 }
 0x30c   :  { %v1333_v49 = vpop.f32.mrf.mxu2 }
 0x30d   :  { %v1867_v56 = vsel %vm1823_vm2, %v1805_v52, 0.0 }
 0x30e   :  { %v1868_v62 = vadd.f32 %v1867_v56, %v1866_v39  ;;  %v1452_v33 = vpop.f32.mrf.mxu3 }
 0x30f   :  { %v1453_v12 = vadd.f32 %v1452_v33, %v3342_v51  ;;  %v1711_v51 = vpop.permute.xlu0 %1710  ;;  %v1202_v53 = vpop.f32.mrf.mxu1 }
 0x311   :  { %v1526_v60 = vmax.f32 %v1453_v12, 0.0 }
 0x313   :  { %v1806_v17 = vmul.f32 %v1701_v41, %v1526_v60  ;;  %v1731_v60 = vpop.permute.xlu1 %1730  ;;  %v1197_v41 = vadd.f32 %v1196_v15, %v3051_v16 }
 0x315   :  { %v1869_v5 = vsel %vm1823_vm2, %v1806_v17, 0.0 }
 0x316   :  { %v1870_v19 = vadd.f32 %v1869_v5, %v1868_v62  ;;  %v1455_v58 = vpop.f32.mrf.mxu3  ;;  %v1200_v5 = vadd.f32 %v1199_v47, %v3069_v42 }
 0x317   :  { %v1456_v13 = vadd.f32 %v1455_v58, %v3351_v45  ;;  %v1726_v11 = vpop.permute.xlu0 %1725 }
 0x319   :  { %v1527_v25 = vmax.f32 %v1456_v13, 0.0 }
 0x31b   :  { %v1807_v44 = vmul.f32 %v1706_v61, %v1527_v25  ;;  %v1736_v25 = vpop.permute.xlu2 %1735  ;;  %v3443_v61 = vld [vmem:[#allocation6_spill] sm:$0xff]  ;;  %v1746_v42 = vpop.permute.xlu1 %1745 }
 0x31d   :  { %v1871_v7 = vsel %vm1823_vm2, %v1807_v44, 0.0  ;;  %v1203_v44 = vadd.f32 %v1202_v53, %v3443_v61 }
 0x31e   :  { %v1872_v63 = vadd.f32 %v1871_v7, %v1870_v19  ;;  %v1458_v29 = vpop.f32.mrf.mxu3  ;;  %v1334_v19 = vadd.f32 %v1333_v49, %v1197_v41 }
 0x31f   :  { %v1459_v32 = vadd.f32 %v1458_v29, %v3360_v26  ;;  %v1336_v26 = vpop.f32.mrf.mxu2  ;;  %v1741_v29 = vpop.permute.xlu0 %1740 }
 0x320   :  { %v1337_v58 = vadd.f32 %v1336_v26, %v1200_v5 }
 0x321   :  { %v1528_v59 = vmax.f32 %v1459_v32, 0.0  ;;  %v3444_v32 = vld [vmem:[#allocation7_spill] sm:$0xff] }
 0x323   :  { %v1808_v34 = vmul.f32 %v1711_v51, %v1528_v59 }
 0x325   :  { %v1873_v22 = vsel %vm1823_vm2, %v1808_v34, 0.0 }
 0x326   :  { %v1874_v14 = vadd.f32 %v1873_v22, %v1872_v63  ;;  %v1461_v24 = vpop.f32.mrf.mxu3 }
 0x327   :  { %v1462_v38 = vadd.f32 %v1461_v24, %v1325_v6  ;;  %v1339_v23 = vpop.f32.mrf.mxu2  ;;  %v3445_v24 = vld [vmem:[#allocation9_spill] sm:$0xff] }
 0x328   :  { %v1340_v51 = vadd.f32 %v1339_v23, %v1203_v44 }
 0x329   :  { %v1529_v45 = vmax.f32 %v1462_v38, 0.0 }
 0x32b   :  { %v1809_v55 = vmul.f32 %v1716_v31, %v1529_v45  ;;  %v3446_v45 = vld [vmem:[#allocation8_spill] sm:$0xff] }
 0x32d   :  { %v1875_v50 = vsel %vm1823_vm2, %v1809_v55, 0.0 }
 0x32e   :  { %v1876_v35 = vadd.f32 %v1875_v50, %v1874_v14  ;;  %v1464_v36 = vpop.f32.mrf.mxu3 }
 0x32f   :  { %v1465_v2 = vadd.f32 %v1464_v36, %v1328_v8  ;;  %v1205_v8 = vpop.f32.mrf.mxu1  ;;  %v1342_v4 = vpop.f32.mrf.mxu2 }
 0x330   :  { %v1206_v59 = vadd.f32 %v1205_v8, %v3444_v32 }
 0x331   :  { %v1530_v10 = vmax.f32 %v1465_v2, 0.0 }
 0x332   :  { %v1343_v15 = vadd.f32 %v1342_v4, %v1206_v59 }
 0x333   :  { %v1810_v0 = vmul.f32 %v1721_v20, %v1530_v10 }
 0x335   :  { %v1877_v43 = vsel %vm1823_vm2, %v1810_v0, 0.0  ;;  %v1751_v0 = vpop.permute.xlu2 %1750 }
 0x336   :  { %v1878_v18 = vadd.f32 %v1877_v43, %v1876_v35  ;;  %v1467_v27 = vpop.f32.mrf.mxu3  ;;  %v3447_v35 = vld [vmem:[#allocation10_spill] sm:$0xff]  ;;  %v3448_v43 = vld [vmem:[#allocation12_spill] sm:$0xff] }
 0x337   :  { %v1468_v46 = vadd.f32 %v1467_v27, %v1331_v9  ;;  %v1208_v39 = vpop.f32.mrf.mxu1  ;;  %v1345_v21 = vpop.f32.mrf.mxu2 }
 0x338   :  { %v1209_v16 = vadd.f32 %v1208_v39, %v3445_v24  ;;  %v1756_v39 = vpop.permute.xlu0 %1755 }
 0x339   :  { %v1531_v6 = vmax.f32 %v1468_v46, 0.0 }
 0x33a   :  { %v1346_v55 = vadd.f32 %v1345_v21, %v1209_v16 }
 0x33b   :  { %v1811_v30 = vmul.f32 %v1726_v11, %v1531_v6  ;;  %v3449_v6 = vld [vmem:[#allocation11_spill] sm:$0xff] }
 0x33d   :  { %v1879_v54 = vsel %vm1823_vm2, %v1811_v30, 0.0  ;;  %v1766_v59 = vpop.permute.xlu2 %1765 }
 0x33e   :  { %v3398_v3 = vadd.f32 %v1879_v54, %v1878_v18  ;;  %v1470_v57 = vpop.f32.mrf.mxu3 }
 0x33f   :  { %v1211_v40 = vpop.f32.mrf.mxu1  ;;  %v1348_v1 = vpop.f32.mrf.mxu2  ;;  %v1471_v13 = vadd.f32 %v1470_v57, %v1334_v19 }
 0x340   :  { %v1212_v31 = vadd.f32 %v1211_v40, %v3446_v45  ;;  %v1771_v24 = vpop.permute.xlu0 %1770 }
 0x341   :  { %v1532_v34 = vmax.f32 %v1471_v13, 0.0 }
 0x342   :  { %v1349_v2 = vadd.f32 %v1348_v1, %v1212_v31 }
 0x343   :  { %v1812_v47 = vmul.f32 %v1731_v60, %v1532_v34 }
 0x345   :  { %v1881_v30 = vsel %vm1823_vm2, %v1812_v47, 0.0 }
 0x346   :  { %v1473_v28 = vpop.f32.mrf.mxu3 }
 0x347   :  { %v1214_v52 = vpop.f32.mrf.mxu1  ;;  %v1351_v56 = vpop.f32.mrf.mxu2  ;;  %v1474_v63 = vadd.f32 %v1473_v28, %v1337_v58 }
 0x348   :  { %v1215_v36 = vadd.f32 %v1214_v52, %v3447_v35  ;;  %v1761_v52 = vpop.permute.xlu1 %1760 }
 0x349   :  { %v1533_v49 = vmax.f32 %v1474_v63, 0.0 }
 0x34a   :  { %v1352_v27 = vadd.f32 %v1351_v56, %v1215_v36  ;;  %v3450_v56 = vld [vmem:[#allocation13_spill] sm:$0xff] }
 0x34b   :  { %v1813_v20 = vmul.f32 %v1736_v25, %v1533_v49 }
 0x34d   :  { %v1883_v21 = vsel %vm1823_vm2, %v1813_v20, 0.0 }
 0x34e   :  { %v1476_v37 = vpop.f32.mrf.mxu3 }
 0x34f   :  { %v1217_v33 = vpop.f32.mrf.mxu1  ;;  %v1354_v12 = vpop.f32.mrf.mxu2  ;;  %v1477_v38 = vadd.f32 %v1476_v37, %v1340_v51 }
 0x350   :  { %v1218_v18 = vadd.f32 %v1217_v33, %v3448_v43  ;;  %v1882_v33 = vadd.f32 %v1881_v30, %v3398_v3  ;;  %v1776_v31 = vpop.permute.xlu1 %1775 }
 0x351   :  { %v1534_v26 = vmax.f32 %v1477_v38, 0.0  ;;  %v3451_v38 = vld [vmem:[#allocation14_spill] sm:$0xff] }
 0x352   :  { %v1355_v57 = vadd.f32 %v1354_v12, %v1218_v18  ;;  %v1884_v19 = vadd.f32 %v1883_v21, %v1882_v33  ;;  %v1781_v18 = vpop.permute.xlu2 %1780 }
 0x353   :  { %v1814_v8 = vmul.f32 %v1741_v29, %v1534_v26 }
 0x355   :  { %v1885_v60 = vsel %vm1823_vm2, %v1814_v8, 0.0  ;;  %v1913_v8 = vpop.permute.xlu0 %1912 }
 0x356   :  { %v1479_v48 = vpop.f32.mrf.mxu3  ;;  %v1886_v61 = vadd.f32 %v1885_v60, %v1884_v19 }
 0x357   :  { %v1220_v7 = vpop.f32.mrf.mxu1  ;;  %v1357_v22 = vpop.f32.mrf.mxu2  ;;  %v1480_v50 = vadd.f32 %v1479_v48, %v1343_v15 }
 0x358   :  { %v1221_v11 = vadd.f32 %v1220_v7, %v3449_v6 }
 0x359   :  { %v1535_v46 = vmax.f32 %v1480_v50, 0.0 }
 0x35a   :  { %v1358_v40 = vadd.f32 %v1357_v22, %v1221_v11 }
 0x35b   :  { %v1815_v48 = vmul.f32 %v1746_v42, %v1535_v46 }
 0x35d   :  { %v1887_v58 = vsel %vm1823_vm2, %v1815_v48, 0.0 }
 0x35e   :  { %v1482_v9 = vpop.f32.mrf.mxu3  ;;  %v1888_v51 = vadd.f32 %v1887_v58, %v1886_v61 }
 0x35f   :  { %v1483_v10 = vadd.f32 %v1482_v9, %v1346_v55  ;;  %v1223_v23 = vpop.f32.mrf.mxu1  ;;  %v1360_v37 = vpop.f32.mrf.mxu2 }
 0x361   :  { %v1536_v4 = vmax.f32 %v1483_v10, 0.0 }
 0x363   :  { %v1816_v41 = vmul.f32 %v1751_v0, %v1536_v4 }
 0x365   :  { %v1889_v7 = vsel %vm1823_vm2, %v1816_v41, 0.0 }
 0x366   :  { %v1485_v62 = vpop.f32.mrf.mxu3  ;;  %v1890_v15 = vadd.f32 %v1889_v7, %v1888_v51 }
 0x367   :  { %v1486_v53 = vadd.f32 %v1485_v62, %v1349_v2  ;;  %v1224_v62 = vadd.f32 %v1223_v23, %v3450_v56  ;;  %v1226_v3 = vpop.f32.mrf.mxu1  ;;  %v1363_v16 = vpop.f32.mrf.mxu2 }
 0x368   :  { %v1227_v42 = vadd.f32 %v1226_v3, %v3451_v38 }
 0x369   :  { %v1537_v1 = vmax.f32 %v1486_v53, 0.0 }
 0x36a   :  { %v1364_v50 = vadd.f32 %v1363_v16, %v1227_v42 }
 0x36b   :  { %v1817_v13 = vmul.f32 %v1756_v39, %v1537_v1 }
 0x36d   :  { %v1891_v34 = vsel %vm1823_vm2, %v1817_v13, 0.0 }
 0x36e   :  { %v1488_v17 = vpop.f32.mrf.mxu3  ;;  %v1892_v55 = vadd.f32 %v1891_v34, %v1890_v15 }
 0x36f   :  { %v1489_v28 = vadd.f32 %v1488_v17, %v1352_v27  ;;  %v1361_v17 = vadd.f32 %v1360_v37, %v1224_v62 }
 0x371   :  { %v1538_v12 = vmax.f32 %v1489_v28, 0.0  ;;  %v1915_v28 = vperm.slane %v1913_v8, 0 }
 0x373   :  { %v1818_v63 = vmul.f32 %v1761_v52, %v1538_v12 }
 0x375   :  { %v1893_v49 = vsel %vm1823_vm2, %v1818_v63, 0.0 }
 0x376   :  { %v1491_v14 = vpop.f32.mrf.mxu3  ;;  %v1894_v36 = vadd.f32 %v1893_v49, %v1892_v55 }
 0x377   :  { %v1492_v9 = vadd.f32 %v1491_v14, %v1355_v57 }
 0x379   :  { %v1539_v25 = vmax.f32 %v1492_v9, 0.0 }
 0x37b   :  { %v1819_v22 = vmul.f32 %v1766_v59, %v1539_v25 }
 0x37d   :  { %v1895_v47 = vsel %vm1823_vm2, %v1819_v22, 0.0 }
 0x37e   :  { %v1494_v54 = vpop.f32.mrf.mxu3  ;;  %v1896_v20 = vadd.f32 %v1895_v47, %v1894_v36 }
 0x37f   :  { %v1495_v5 = vadd.f32 %v1494_v54, %v1358_v40 }
 0x381   :  { %v1540_v29 = vmax.f32 %v1495_v5, 0.0 }
 0x383   :  { %v1820_v45 = vmul.f32 %v1771_v24, %v1540_v29 }
 0x385   :  { %v1897_v26 = vsel %vm1823_vm2, %v1820_v45, 0.0 }
 0x386   :  { %v1497_v44 = vpop.f32.mrf.mxu3  ;;  %v1898_v27 = vadd.f32 %v1897_v26, %v1896_v20 }
 0x387   :  { %v1498_v32 = vadd.f32 %v1497_v44, %v1361_v17 }
 0x389   :  { %v1541_v14 = vmax.f32 %v1498_v32, 0.0 }
 0x38b   :  { %v1821_v35 = vmul.f32 %v1776_v31, %v1541_v14 }
 0x38d   :  { %v1899_v0 = vsel %vm1823_vm2, %v1821_v35, 0.0 }
 0x38e   :  { %v1500_v2 = vpop.f32.mrf.mxu3  ;;  %v1900_v53 = vadd.f32 %v1899_v0, %v1898_v27 }
 0x38f   :  { %v1501_v10 = vadd.f32 %v1500_v2, %v1364_v50 }
 0x391   :  { %v1542_v43 = vmax.f32 %v1501_v10, 0.0 }
 0x393   :  { %v1822_v46 = vmul.f32 %v1781_v18, %v1542_v43 }
 0x395   :  { %v1901_v6 = vsel %vm1823_vm2, %v1822_v46, 0.0 }
 0x396   :  { %v1902_v11 = vadd.f32 %v1901_v6, %v1900_v53 }
 0x398   :  { %v1903_v23 = vrot.slane %v1902_v11, 4 }
 0x39a   :  { %v1904_v30 = vadd.f32 %v1903_v23, %v1902_v11 }
 0x39c   :  { %v1905_v54 = vrot.slane %v1904_v30, 2 }
 0x39e   :  { %v1906_v57 = vadd.f32 %v1905_v54, %v1904_v30 }
 0x3a0   :  { %v1907_v4 = vrot.slane %v1906_v57, 1 }
 0x3a2   :  { %v1908_v39 = vadd.f32 %v1907_v4, %v1906_v57 }
 0x3a4   :  { %v1916_v21 = vadd.f32 %v1915_v28, %v1908_v39 }
 0x3a6   :  { %1918 = vst.msk [vmem:[#allocation3] sm:$0x1] %vm1917_vm3, %v1916_v21 }
 0x3a7   :  { %1929 = dma.vmem_to_hbm [thread:$0]  %s1925_s18, 16, %s1927_s2, [#allocation4]  }
 0x3a8   :  { %2061 = dma.done.wait [#allocation4], 16  }
 0x3a9   :  { %2062 = vsyncadd [#allocation4], 4294967280 }
 0x3aa   :  { %1934 = vsyncpa [#allocation4], 1 }

</bundles_post_ra>
